<compile_context>
chip_gen: v7x
topology: tpu7x:2x2x1
jax: 0.10.0
libtpu: 0.0.40
codegen_flags: <defaults>
</compile_context>

<pallas_src>
import numpy as np
import jax
import jax.numpy as jnp
from jax.experimental import pallas as pl
from jax.experimental.pallas import tpu as pltpu


# ----------------------------------------------------------------------------
# Helpers
# ----------------------------------------------------------------------------
def _round_up(x, m):
    return ((x + m - 1) // m) * m


def _pad_axis(x, size, axis):
    cur = x.shape[axis]
    if cur == size:
        return x
    pad = [(0, 0)] * x.ndim
    pad[axis] = (0, size - cur)
    return jnp.pad(x, pad)


def _pick_tile_n(d_pad, max_b_pad=128, budget_bytes=24 * (1 << 20)):
    """Largest lane-aligned N tile whose double-buffered W stream plus the
    resident per-sample tensors fit a conservative scoped-VMEM budget
    (sized against v7x's 64 MiB physical / 32 MiB default-scoped VMEM)."""
    for tn in (1024, 512, 256, 128):
        if d_pad % tn != 0:
            continue
        w_bufs = 2 * d_pad * tn * 2                 # 2x (D, tn) bf16 W tiles
        resident = 2 * max_b_pad * d_pad * 4        # x0 + noise, f32, resident
        col_bufs = 2 * 2 * max_b_pad * tn * 4       # bias in + loss out, 2x buffered
        if w_bufs + resident + col_bufs <= budget_bytes:
            return tn
    # TODO(synk): K-reduction grid axis needed here for very large D.
    return 128


# ----------------------------------------------------------------------------
# Pallas kernel: fused q_sample + linear model + elementwise MSE (no reduction)
# One grid step computes one (B, tn) column tile of the loss.
# ----------------------------------------------------------------------------
def _make_kernel(tn):
    def kernel(x0_ref, noise_ref, sab_ref, s1ab_ref, bias_ref, w_ref, loss_ref):
        n = pl.program_id(0)

        # q_sample (f32 on the VPU): x_t = sqrt_ab[t]*x_0 + sqrt_1mab[t]*noise
        # Recomputed per N tile: 3*B*D VPU ops, hidden under the W-tile DMA.
        x_t = sab_ref[...] * x0_ref[...] + s1ab_ref[...] * noise_ref[...]   # (B, D)

        # Synthetic model tile: bf16 only at the MXU boundary, f32 accumulate.
        pred = jnp.dot(x_t.astype(jnp.bfloat16), w_ref[0],
                       preferred_element_type=jnp.float32)                  # (B, tn)
        pred = pred + bias_ref[...]

        # F.mse_loss(pred, noise, reduction='none') for this column tile.
        # MSE target sliced from the already-resident noise (no duplicate stream).
        start = pl.multiple_of(n * tn, 128)
        diff = pred - noise_ref[:, pl.ds(start, tn)]
        loss_ref[...] = diff * diff

    return kernel


def fused_diffusion_loss(x0_flat, noise_flat, sab, s1ab, bias, w_tiled, tn):
    """x0/noise/bias: (B_pad, D_pad) f32; sab/s1ab: (B_pad, 1) f32;
    w_tiled: (D_pad//tn, D_pad, tn) bf16, contiguous pre-tiled column blocks."""
    B, D = x0_flat.shape
    num_tiles, d_w, tn_w = w_tiled.shape
    assert d_w == D and tn_w == tn and num_tiles * tn == D

    full_blk = lambda n: (0, 0)     # resident across the whole grid (single DMA)
    col_blk = lambda n: (0, n)      # streamed column tiles
    w_blk = lambda n: (n, 0, 0)     # contiguous pre-tiled W block

    cost = pl.CostEstimate(
        flops=(2 * B * D * D                # MXU
               + 3 * B * D * num_tiles      # per-tile q_sample recompute
               + 3 * B * tn * num_tiles),   # bias add + sub + square
        transcendentals=0,
        bytes_accessed=(D * D * 2           # W (bf16)
                        + 3 * B * D * 4     # x0, noise, bias (f32)
                        + B * D * 4         # loss out
                        + 2 * B * 4))       # per-sample scales

    # Explicit scoped-VMEM limit: v5e defaults to 16 MiB (of 128 physical),
    # v7x has only 64 MiB physical — size to actual use, never above 48 MiB.
    needed = (2 * D * tn * 2            # double-buffered W tile (bf16)
              + 2 * B * D * 4           # resident x0 + noise
              + 2 * 2 * B * tn * 4      # bias in + loss out, double-buffered
              + 4 * B * 4)              # scales
    vmem_limit = int(min(max(2 * needed, 16 << 20), 48 << 20))

    return pl.pallas_call(
        _make_kernel(tn),
        out_shape=jax.ShapeDtypeStruct((B, D), jnp.float32),
        grid=(num_tiles,),
        in_specs=[
            pl.BlockSpec((B, D), full_blk),      # x_0             (resident)
            pl.BlockSpec((B, D), full_blk),      # noise           (resident + MSE target)
            pl.BlockSpec((B, 1), full_blk),      # sqrt_alphas_bar[t]
            pl.BlockSpec((B, 1), full_blk),      # sqrt_one_minus_alphas_bar[t]
            pl.BlockSpec((B, tn), col_blk),      # conditioning bias tile
            pl.BlockSpec((1, D, tn), w_blk),     # W column tile (bf16) - the big stream
        ],
        out_specs=pl.BlockSpec((B, tn), col_blk),
        # TODO(synk): on v7x switch this axis to pltpu.CORE_PARALLEL (or
        # pl.core_map over create_tensorcore_mesh) so both TensorCores each
        # stream half the W columns; plain "parallel" does not shard there.
        compiler_params=pltpu.CompilerParams(
            dimension_semantics=("parallel",),
            vmem_limit_bytes=vmem_limit),
        cost_estimate=cost,
    )(x0_flat, noise_flat, sab, s1ab, bias, w_tiled)


# ----------------------------------------------------------------------------
# GaussianDiffusionTrainer (JAX/Pallas)
# ----------------------------------------------------------------------------
class GaussianDiffusionTrainer:
    def __init__(self, beta_1, beta_T, T, C, H, W, num_labels, num_label2, key):
        self.T = T
        self.shape = (C, H, W)
        self.D = C * H * W
        # Lane-aligned feature width so every block store is unmasked.
        self.D_pad = max(128, _round_up(self.D, 128))
        self.tn = _pick_tile_n(self.D_pad)

        # Schedule buffers in float64 (matches torch .double()); the gather
        # casts to float32 exactly like extract() in the PyTorch reference.
        betas = np.linspace(beta_1, beta_T, T, dtype=np.float64)
        alphas = 1.0 - betas
        alphas_bar = np.cumprod(alphas, axis=0)
        self.sqrt_alphas_bar = jnp.asarray(np.sqrt(alphas_bar), jnp.float32)
        self.sqrt_one_minus_alphas_bar = jnp.asarray(
            np.sqrt(1.0 - alphas_bar), jnp.float32)

        # Deterministic synthetic model parameters.  W is stored in bf16
        # (halves the dominant HBM stream, native MXU input) and pre-tiled in
        # HBM as contiguous (num_tiles, D, tn) column blocks so each streamed
        # tile is one full-length DMA burst.
        kw, kt, kl1, kl2 = jax.random.split(key, 4)
        D = self.D_pad
        w = (jax.random.normal(kw, (D, D), jnp.float32)
             / np.sqrt(D)).astype(jnp.bfloat16)
        num_tiles = D // self.tn
        self.model_w = w                                           # (D, D) for reference
        self.model_w_tiled = jnp.transpose(
            w.reshape(D, num_tiles, self.tn), (1, 0, 2))           # (nt, D, tn)
        # TODO(synk): on v7x store W as fp8(e4m3)+per-column scales (int8 on
        # v6e) to halve the W stream again; bf16 kept as the portable default.
        self.t_emb = 0.01 * jax.random.normal(kt, (T, D), jnp.float32)
        self.lab_emb = 0.01 * jax.random.normal(kl1, (num_labels, D), jnp.float32)
        self.lab2_emb = 0.01 * jax.random.normal(kl2, (num_label2, D), jnp.float32)

    def forward(self, x_0, labels, label2, key):
        B = x_0.shape[0]
        kt, kn = jax.random.split(key)

        # t = torch.randint(T, size=(B,)); noise = torch.randn_like(x_0)
        t = jax.random.randint(kt, (B,), 0, self.T)
        noise = jax.random.normal(kn, x_0.shape, dtype=jnp.float32)

        # extract(v, t, x_shape): gather + view([B, 1, 1, 1]) -> (B, 1) on flat layout
        sab = self.sqrt_alphas_bar[t].reshape(B, 1)
        s1ab = self.sqrt_one_minus_alphas_bar[t].reshape(B, 1)

        # NCHW -> (B, D), zero-pad features to lane-aligned D_pad.
        x0_flat = _pad_axis(x_0.reshape(B, self.D).astype(jnp.float32), self.D_pad, 1)
        noise_flat = _pad_axis(noise.reshape(B, self.D), self.D_pad, 1)

        # Pre-gather model conditioning bias (tiny glue).
        bias = self.t_emb[t] + self.lab_emb[labels] + self.lab2_emb[label2]

        # Pad batch to a full sublane group (16 covers bf16 packing too).
        # Padded rows (sab/s1ab/x0/noise all zero) give exactly-zero loss.
        b_pad = _round_up(max(B, 8), 16)
        # TODO(synk): batch multiple forward() micro-batches into one
        # pallas_call so effective B >= 64-128 rows and the W stream is
        # amortized over more MXU rows (arithmetic intensity ~ B flops/byte).
        loss_flat = fused_diffusion_loss(
            _pad_axis(x0_flat, b_pad, 0),
            _pad_axis(noise_flat, b_pad, 0),
            _pad_axis(sab, b_pad, 0),
            _pad_axis(s1ab, b_pad, 0),
            _pad_axis(bias, b_pad, 0),
            self.model_w_tiled,
            self.tn)

        # reduction='none' -> same shape as x_0 (NCHW)
        return loss_flat[:B, :self.D].reshape((B,) + self.shape)


# ----------------------------------------------------------------------------
if __name__ == "__main__":
    B, C, H, W = 2, 4, 16, 16
    T = 100
    num_labels, num_label2 = 10, 5

    key = jax.random.PRNGKey(0)
    k_params, k_x, k_lab, k_lab2, k_fwd = jax.random.split(key, 5)

    trainer = GaussianDiffusionTrainer(
        beta_1=1e-4, beta_T=0.02, T=T,
        C=C, H=H, W=W,
        num_labels=num_labels, num_label2=num_label2,
        key=k_params)

    x_0 = jax.random.normal(k_x, (B, C, H, W), jnp.float32)
    labels = jax.random.randint(k_lab, (B,), 0, num_labels)
    label2 = jax.random.randint(k_lab2, (B,), 0, num_label2)

    loss = trainer.forward(x_0, labels, label2, k_fwd)
    loss = jax.block_until_ready(loss)

    assert loss.shape == (B, C, H, W)
    assert loss.dtype == jnp.float32
    assert bool(jnp.all(jnp.isfinite(loss)))

    # Plain-JAX reference with the same t/noise draws (same key splits).
    kt, kn = jax.random.split(k_fwd)
    t_ref = jax.random.randint(kt, (B,), 0, T)
    noise_ref = jax.random.normal(kn, x_0.shape, dtype=jnp.float32)
    sab_r = trainer.sqrt_alphas_bar[t_ref].reshape(B, 1, 1, 1)
    s1ab_r = trainer.sqrt_one_minus_alphas_bar[t_ref].reshape(B, 1, 1, 1)
    x_t = (sab_r * x_0 + s1ab_r * noise_ref).reshape(B, trainer.D)
    x_t = jnp.pad(x_t, ((0, 0), (0, trainer.D_pad - trainer.D)))
    pred = jnp.dot(x_t.astype(jnp.bfloat16), trainer.model_w,
                   preferred_element_type=jnp.float32)
    pred = pred + (trainer.t_emb[t_ref] + trainer.lab_emb[labels]
                   + trainer.lab2_emb[label2])
    ref = ((pred[:, :trainer.D] - noise_ref.reshape(B, trainer.D)) ** 2
           ).reshape(B, C, H, W)
    assert bool(jnp.allclose(loss, ref, rtol=5e-3, atol=5e-3))

    print("KERNEL_OK")
</pallas_src>

<mosaic_0001>
module attributes {stable_mosaic.version = 11 : i64} {
  func.func @kernel(%arg0: i32, %arg1: memref<16x1024xf32, #tpu.memory_space<vmem>>, %arg2: memref<16x1024xf32, #tpu.memory_space<vmem>>, %arg3: memref<16x1xf32, #tpu.memory_space<vmem>>, %arg4: memref<16x1xf32, #tpu.memory_space<vmem>>, %arg5: memref<16x1024xf32, #tpu.memory_space<vmem>>, %arg6: memref<1x1024x1024xbf16, #tpu.memory_space<vmem>>, %arg7: memref<16x1024xf32, #tpu.memory_space<vmem>>) attributes {dimension_semantics = [#tpu.dimension_semantics<parallel>], iteration_bounds = array<i64: 1>, scalar_prefetch = 0 : i64, scratch_operands = 0 : i64, tpu.core_type = #tpu.core_type<tc>, window_params = [{pipeline_mode = #tpu.pipeline_mode<synchronous>, transform_indices = @transform_0, window_bounds = array<i64: 16, 1024>}, {pipeline_mode = #tpu.pipeline_mode<synchronous>, transform_indices = @transform_1, window_bounds = array<i64: 16, 1024>}, {pipeline_mode = #tpu.pipeline_mode<synchronous>, transform_indices = @transform_2, window_bounds = array<i64: 16, 1>}, {pipeline_mode = #tpu.pipeline_mode<synchronous>, transform_indices = @transform_3, window_bounds = array<i64: 16, 1>}, {transform_indices = @transform_4, window_bounds = array<i64: 16, 1024>}, {transform_indices = @transform_5, window_bounds = array<i64: 1, 1024, 1024>}, {transform_indices = @transform_6, window_bounds = array<i64: 16, 1024>}]} {
    %c0 = arith.constant 0 : index
    %c0_0 = arith.constant 0 : index
    %0 = vector.load %arg3[%c0, %c0_0] : memref<16x1xf32, #tpu.memory_space<vmem>>, vector<16x1xf32>
    %c0_1 = arith.constant 0 : index
    %c0_2 = arith.constant 0 : index
    %1 = vector.load %arg1[%c0_1, %c0_2] : memref<16x1024xf32, #tpu.memory_space<vmem>>, vector<16x1024xf32>
    %2 = vector.broadcast %0 : vector<16x1xf32> to vector<16x1024xf32>
    %3 = arith.mulf %2, %1 : vector<16x1024xf32>
    %c0_3 = arith.constant 0 : index
    %c0_4 = arith.constant 0 : index
    %4 = vector.load %arg4[%c0_3, %c0_4] : memref<16x1xf32, #tpu.memory_space<vmem>>, vector<16x1xf32>
    %c0_5 = arith.constant 0 : index
    %c0_6 = arith.constant 0 : index
    %5 = vector.load %arg2[%c0_5, %c0_6] : memref<16x1024xf32, #tpu.memory_space<vmem>>, vector<16x1024xf32>
    %6 = vector.broadcast %4 : vector<16x1xf32> to vector<16x1024xf32>
    %7 = arith.mulf %6, %5 : vector<16x1024xf32>
    %8 = arith.addf %3, %7 : vector<16x1024xf32>
    %9 = arith.truncf %8 : vector<16x1024xf32> to vector<16x1024xbf16>
    %c0_7 = arith.constant 0 : index
    %c0_8 = arith.constant 0 : index
    %c0_9 = arith.constant 0 : index
    %10 = vector.load %arg6[%c0_7, %c0_8, %c0_9] : memref<1x1024x1024xbf16, #tpu.memory_space<vmem>>, vector<1x1024x1024xbf16>
    %11 = vector.shape_cast %10 : vector<1x1024x1024xbf16> to vector<1024x1024xbf16>
    %cst = arith.constant dense<0.000000e+00> : vector<16x1024xf32>
    %12 = tpu.matmul %9, %11, %cst {dimension_numbers = #tpu.dot_dimension_numbers<[1], [0], [0], [1], [0, 0, 1, 1], [], []>} : vector<16x1024xbf16>, vector<1024x1024xbf16>, vector<16x1024xf32> -> vector<16x1024xf32>
    %c0_10 = arith.constant 0 : index
    %c0_11 = arith.constant 0 : index
    %13 = vector.load %arg5[%c0_10, %c0_11] : memref<16x1024xf32, #tpu.memory_space<vmem>>, vector<16x1024xf32>
    %14 = arith.addf %12, %13 : vector<16x1024xf32>
    %c1024_i32 = arith.constant 1024 : i32
    %15 = arith.muli %arg0, %c1024_i32 : i32
    %16 = tpu.assume_multiple %15, 128 : i32
    %c0_12 = arith.constant 0 : index
    %17 = arith.index_cast %16 : i32 to index
    %18 = vector.load %arg2[%c0_12, %17] : memref<16x1024xf32, #tpu.memory_space<vmem>>, vector<16x1024xf32>
    %19 = arith.subf %14, %18 : vector<16x1024xf32>
    %20 = arith.mulf %19, %19 : vector<16x1024xf32>
    %c0_13 = arith.constant 0 : index
    %c0_14 = arith.constant 0 : index
    %21 = vector.load %arg7[%c0_13, %c0_14] : memref<16x1024xf32, #tpu.memory_space<vmem>>, vector<16x1024xf32>
    tpu.vector_store %arg7[%c0_13, %c0_14], %20 {strides = array<i32>} : memref<16x1024xf32, #tpu.memory_space<vmem>>, vector<16x1024xf32>,
    return
  }
  func.func @transform_0(%arg0: i32) -> (i32, i32) {
    %c0_i32 = arith.constant 0 : i32
    %c0_i32_0 = arith.constant 0 : i32
    %c0_i32_1 = arith.constant 0 : i32
    return %c0_i32, %c0_i32_0 : i32, i32
  }
  func.func @transform_1(%arg0: i32) -> (i32, i32) {
    %c0_i32 = arith.constant 0 : i32
    %c0_i32_0 = arith.constant 0 : i32
    %c0_i32_1 = arith.constant 0 : i32
    return %c0_i32, %c0_i32_0 : i32, i32
  }
  func.func @transform_2(%arg0: i32) -> (i32, i32) {
    %c0_i32 = arith.constant 0 : i32
    %c0_i32_0 = arith.constant 0 : i32
    %c0_i32_1 = arith.constant 0 : i32
    return %c0_i32, %c0_i32_0 : i32, i32
  }
  func.func @transform_3(%arg0: i32) -> (i32, i32) {
    %c0_i32 = arith.constant 0 : i32
    %c0_i32_0 = arith.constant 0 : i32
    %c0_i32_1 = arith.constant 0 : i32
    return %c0_i32, %c0_i32_0 : i32, i32
  }
  func.func @transform_4(%arg0: i32) -> (i32, i32) {
    %c0_i32 = arith.constant 0 : i32
    %c0_i32_0 = arith.constant 0 : i32
    return %c0_i32, %arg0 : i32, i32
  }
  func.func @transform_5(%arg0: i32) -> (i32, i32, i32) {
    %c0_i32 = arith.constant 0 : i32
    %c0_i32_0 = arith.constant 0 : i32
    %c0_i32_1 = arith.constant 0 : i32
    return %arg0, %c0_i32, %c0_i32_0 : i32, i32, i32
  }
  func.func @transform_6(%arg0: i32) -> (i32, i32) {
    %c0_i32 = arith.constant 0 : i32
    %c0_i32_0 = arith.constant 0 : i32
    return %c0_i32, %arg0 : i32, i32
  }
}

</mosaic_0001>

<bundles_post_ra>
// kernel: tpu_custom_call.1
= control target key start
LH: loop header
LB: loop body
LE: loop exit
PB: predicated region body
PF: predicated region fallthrough
CT: control target
= control target key end

     0   :  { %11 = vsyncpa [#allocation3], 0  ;;  %s5064_s0 = inlined_call_operand.hbm [shape: f32[16,1024], index: 0, kind: input, shape index: {}]   ;;  %s5065_s1 = inlined_call_operand.hbm [shape: f32[16,1024], index: 1, kind: input, shape index: {}]   ;;  %s5066_s2 = inlined_call_operand.vmem [shape: f32[16,1], index: 2, kind: input, shape index: {}]   ;;  %s5067_s3 = inlined_call_operand.vmem [shape: f32[16,1], index: 3, kind: input, shape index: {}]   ;;  %s5068_s4 = inlined_call_operand.hbm [shape: f32[16,1024], index: 4, kind: input, shape index: {}]   ;;  %s5069_s5 = inlined_call_operand.hbm [shape: bf16[1,1024,1024], index: 5, kind: input, shape index: {}]   ;;  %s5070_s6 = inlined_call_operand.hbm [shape: f32[16,1024], index: 6, kind: output, shape index: {}]  }
   0x1   :  { %12 = vsyncpa [#allocation6], 0 }
   0x2   :  { %13 = vsyncpa [#allocation9], 0 }
   0x3   :  { %14 = vsyncpa [#allocation4], 0  ;;  %s4763_s21 = smov [#allocation5]   ;;  %s4764_s23 = smov [#allocation2]  }
   0x4   :  { %s32_s22 = sshll.u32 %s4763_s21, 4  ;;  %s20_s24 = sshll.u32 %s4764_s23, 4  ;;  %s33_s22 = int_to_ptr.vmem [resolvable:$true] %s32_s22  ;;  %s4808_s24 = int_to_ptr.vmem [resolvable:$true] %s20_s24 }
   0x5   :  { %s4645_s27 = scalar_lea.hbm %s5065_s1, 2048 }
   0x6   :  { %p4646_p0 = scmp.ne.s32.totalorder %s5065_s1, %s4645_s27  ;;  %p4649_p1 = scmp.lt.u32.totalorder %s4645_s27, %s5065_s1 }
   0x8   :  { %p4651_p2 = pnand %p4649_p1, %p4646_p0 }
   0xa   :  { %4654 = shalt.err (!%p4651_p2)
}
   0xb   :  { %s4655_s8 = scalar_lea.vmem %s33_s22, 2048  ;;  %p4660_p4 = scmp.lt.s32.totalorder %s33_s22, %s33_s22 }
   0xc   :  { %p4656_p3 = scmp.ne.s32.totalorder %s33_s22, %s4655_s8  ;;  %p4661_p5 = scmp.lt.s32.totalorder %s4655_s8, %s4655_s8 }
   0xe   :  { %p4662_p6 = por %p4661_p5, %p4660_p4 }
  0x10   :  { %p4663_p7 = pnand %p4662_p6, %p4656_p3 }
  0x12   :  { %4666 = shalt.err (!%p4663_p7)
}
  0x13   :  { %s4765_s9 = smov 1024   ;;  %s4766_s10 = smov 64  }
  0x14   :  { %38 = dma.hbm_to_vmem [thread:$0]  %s5065_s1, 2048, %s33_s22, [#allocation6], %s4765_s9, %s4765_s9, %s4766_s10  }
  0x15   :  { %s4667_s15 = scalar_lea.hbm %s5064_s0, 2048 }
  0x16   :  { %p4668_p8 = scmp.ne.s32.totalorder %s5064_s0, %s4667_s15  ;;  %p4671_p9 = scmp.lt.u32.totalorder %s4667_s15, %s5064_s0 }
  0x18   :  { %p4673_p10 = pnand %p4671_p9, %p4668_p8 }
  0x1a   :  { %4676 = shalt.err (!%p4673_p10)
}
  0x1b   :  { %s4677_s20 = scalar_lea.vmem %s4808_s24, 2048  ;;  %p4682_p12 = scmp.lt.s32.totalorder %s4808_s24, %s4808_s24 }
  0x1c   :  { %p4678_p11 = scmp.ne.s32.totalorder %s4808_s24, %s4677_s20  ;;  %p4683_p13 = scmp.lt.s32.totalorder %s4677_s20, %s4677_s20 }
  0x1e   :  { %p4684_p0 = por %p4683_p13, %p4682_p12 }
  0x20   :  { %p4685_p1 = pnand %p4684_p0, %p4678_p11 }
  0x22   :  { %4688 = shalt.err (!%p4685_p1)
}
  0x23   :  { %26 = dma.hbm_to_vmem [thread:$0]  %s5064_s0, 2048, %s4808_s24, [#allocation3], %s4765_s9, %s4765_s9, %s4766_s10  }
  0x24   :  { %s4767_s22 = smov [#allocation7]   ;;  %s4768_s25 = smov [#allocation8]  }
  0x25   :  { %s48_s23 = sshll.u32 %s4767_s22, 4  ;;  %s60_s26 = sshll.u32 %s4768_s25, 4  ;;  %s49_s23 = int_to_ptr.vmem [resolvable:$true] %s48_s23  ;;  %s4845_s26 = int_to_ptr.vmem [resolvable:$true] %s60_s26 }
  0x26   :  { %s4689_s29 = scalar_lea.hbm %s5068_s4, 2048 }
  0x27   :  { %p4690_p2 = scmp.ne.s32.totalorder %s5068_s4, %s4689_s29  ;;  %p4693_p3 = scmp.lt.u32.totalorder %s4689_s29, %s5068_s4 }
  0x29   :  { %p4695_p4 = pnand %p4693_p3, %p4690_p2 }
  0x2b   :  { %4698 = shalt.err (!%p4695_p4)
}
  0x2c   :  { %s4699_s0 = scalar_lea.vmem %s49_s23, 2048  ;;  %p4704_p6 = scmp.lt.s32.totalorder %s49_s23, %s49_s23 }
  0x2d   :  { %p4700_p5 = scmp.ne.s32.totalorder %s49_s23, %s4699_s0  ;;  %p4705_p7 = scmp.lt.s32.totalorder %s4699_s0, %s4699_s0 }
  0x2f   :  { %p4706_p8 = por %p4705_p7, %p4704_p6 }
  0x31   :  { %p4707_p9 = pnand %p4706_p8, %p4700_p5 }
  0x33   :  { %4710 = shalt.err (!%p4707_p9)
}
  0x34   :  { %54 = dma.hbm_to_vmem [thread:$0]  %s5068_s4, 2048, %s49_s23, [#allocation6], %s4765_s9, %s4765_s9, %s4766_s10  }
  0x35   :  { %s4711_s15 = scalar_lea.hbm %s5069_s5, 65536 }
  0x36   :  { %p4712_p10 = scmp.ne.s32.totalorder %s5069_s5, %s4711_s15  ;;  %p4715_p11 = scmp.lt.u32.totalorder %s4711_s15, %s5069_s5 }
  0x38   :  { %p4717_p12 = pnand %p4715_p11, %p4712_p10 }
  0x3a   :  { %4720 = shalt.err (!%p4717_p12)
}
  0x3b   :  { %s4721_s20 = scalar_lea.vmem %s4845_s26, 65536  ;;  %p4726_p0 = scmp.lt.s32.totalorder %s4845_s26, %s4845_s26 }
  0x3c   :  { %p4722_p13 = scmp.ne.s32.totalorder %s4845_s26, %s4721_s20  ;;  %p4727_p1 = scmp.lt.s32.totalorder %s4721_s20, %s4721_s20 }
  0x3e   :  { %p4728_p2 = por %p4727_p1, %p4726_p0 }
  0x40   :  { %p4729_p3 = pnand %p4728_p2, %p4722_p13 }
  0x42   :  { %4732 = shalt.err (!%p4729_p3)
}
  0x43   :  { %s4769_s4 = smov 512   ;;  %s4770_s1 = smov 32  }
  0x44   :  { %66 = dma.hbm_to_vmem [thread:$0]  %s5069_s5, 65536, %s4845_s26, [#allocation9], %s4769_s4, %s4769_s4, %s4770_s1  }
  0x45   :  { %4755 = dma.done.wait [#allocation3], 2048  }
  0x46   :  { %4756 = vsyncadd [#allocation3], 4294965248 }
  0x47   :  { %4757 = dma.done.wait [#allocation6], 4096  }
  0x48   :  { %4758 = vsyncadd [#allocation6], 4294963200 }
  0x49   :  { %4759 = dma.done.wait [#allocation9], 65536  }
  0x4a   :  { %4760 = vsyncadd [#allocation9], 4294901760  ;;  %v4771_v0 = vmov 0   ;;  %v123_v1 = vld [vmem:[%s5067_s3] sm:$0xff]  ;;  %v124_v3 = vld [vmem:[%s5067_s3 + $0x8] sm:$0xff] }
  0x4b   :  { %4644 = vset.pattern.permute.xlu1 %v4771_v0  ;;  %4643 = vset.pattern.permute.xlu0 %v4771_v0  ;;  %v79_v2 = vld [vmem:[%s5066_s2] sm:$0xff]  ;;  %v80_v4 = vld [vmem:[%s5066_s2 + $0x8] sm:$0xff]  ;;  %s4772_s2 = smov [#allocation10]  }
  0x4c   :  { %143 = vperm.xlu1 %4644, %v123_v1   ;;  %99 = vperm.xlu0 %4643, %v79_v2   ;;  %v191_v5 = vld [vmem:[#allocation8] sm:$0xff]  ;;  %v192_v8 = vld [vmem:[#allocation8 + $0x8] sm:$0xff]  ;;  %s4041_s3 = sshll.u32 %s4772_s2, 4  ;;  %s4042_s3 = int_to_ptr.vmem [resolvable:$true] %s4041_s3 }
  0x4d   :  { %v195_v6 = vld [vmem:[#allocation8 + $0x20] sm:$0xff]  ;;  %v196_v9 = vld [vmem:[#allocation8 + $0x28] sm:$0xff]  ;;  %s4733_s7 = scalar_lea.vmem %s4042_s3, 2048  ;;  %p4738_p5 = scmp.lt.s32.totalorder %s4042_s3, %s4042_s3 }
  0x4e   :  { %v4058_v7 = vcombine.high %v191_v5, %v195_v6  ;;  %v4057_v10 = vcombine.low %v191_v5, %v195_v6  ;;  %v199_v11 = vld [vmem:[#allocation8 + $0x40] sm:$0xff]  ;;  %v4060_v12 = vcombine.high %v192_v8, %v196_v9  ;;  %v4059_v13 = vcombine.low %v192_v8, %v196_v9  ;;  %v200_v15 = vld [vmem:[#allocation8 + $0x48] sm:$0xff]  ;;  %p4734_p4 = scmp.ne.s32.totalorder %s4042_s3, %s4733_s7  ;;  %p4739_p6 = scmp.lt.s32.totalorder %s4733_s7, %s4733_s7 }
  0x4f   :  { %v203_v14 = vld [vmem:[#allocation8 + $0x60] sm:$0xff]  ;;  %v204_v16 = vld [vmem:[#allocation8 + $0x68] sm:$0xff] }
  0x50   :  { %3279 = vmatprep.subr.bf16.mxu0 %v4058_v7  ;;  %v4066_v17 = vcombine.high %v199_v11, %v203_v14  ;;  %v4068_v18 = vcombine.high %v200_v15, %v204_v16  ;;  %v207_v19 = vld [vmem:[#allocation8 + $0x80] sm:$0xff]  ;;  %148 = vperm.xlu1 %4644, %v124_v3   ;;  %v208_v21 = vld [vmem:[#allocation8 + $0x88] sm:$0xff]  ;;  %v4065_v23 = vcombine.low %v199_v11, %v203_v14  ;;  %p4740_p7 = por %p4739_p6, %p4738_p5 }
  0x51   :  { %v211_v20 = vld [vmem:[#allocation8 + $0xa0] sm:$0xff]  ;;  %104 = vperm.xlu0 %4643, %v80_v4   ;;  %v212_v22 = vld [vmem:[#allocation8 + $0xa8] sm:$0xff]  ;;  %3451 = vmatprep.subr.bf16.mxu1 %v4060_v12  ;;  %v4067_v24 = vcombine.low %v200_v15, %v204_v16 }
  0x52   :  { %3280 = vmatpush1.bf16.msra.mxu0 %v4057_v10  ;;  %3452 = vmatpush1.bf16.msra.mxu1 %v4059_v13  ;;  %v4074_v25 = vcombine.high %v207_v19, %v211_v20  ;;  %v4076_v26 = vcombine.high %v208_v21, %v212_v22  ;;  %v215_v27 = vld [vmem:[#allocation8 + $0xc0] sm:$0xff]  ;;  %v216_v29 = vld [vmem:[#allocation8 + $0xc8] sm:$0xff]  ;;  %v4073_v31 = vcombine.low %v207_v19, %v211_v20  ;;  %p4741_p8 = pnand %p4740_p7, %p4734_p4 }
  0x53   :  { %3281 = vmatprep.subr.bf16.mxu0 %v4066_v17  ;;  %3453 = vmatprep.subr.bf16.mxu1 %v4068_v18  ;;  %v219_v28 = vld [vmem:[#allocation8 + $0xe0] sm:$0xff]  ;;  %v220_v30 = vld [vmem:[#allocation8 + $0xe8] sm:$0xff]  ;;  %v4075_v32 = vcombine.low %v208_v21, %v212_v22 }
  0x54   :  { %v4082_v33 = vcombine.high %v215_v27, %v219_v28  ;;  %v4084_v34 = vcombine.high %v216_v29, %v220_v30  ;;  %v223_v35 = vld [vmem:[#allocation8 + $0x100] sm:$0xff]  ;;  %v224_v37 = vld [vmem:[#allocation8 + $0x108] sm:$0xff]  ;;  %v4081_v39 = vcombine.low %v215_v27, %v219_v28  ;;  %v4083_v40 = vcombine.low %v216_v29, %v220_v30 }
  0x55   :  { %v227_v36 = vld [vmem:[#allocation8 + $0x120] sm:$0xff]  ;;  %v228_v38 = vld [vmem:[#allocation8 + $0x128] sm:$0xff] }
  0x56   :  { %3282 = vmatpush1.bf16.msra.mxu0 %v4065_v23  ;;  %3454 = vmatpush1.bf16.msra.mxu1 %v4067_v24  ;;  %v4090_v41 = vcombine.high %v223_v35, %v227_v36  ;;  %v4092_v42 = vcombine.high %v224_v37, %v228_v38  ;;  %v231_v43 = vld [vmem:[#allocation8 + $0x140] sm:$0xff]  ;;  %v232_v45 = vld [vmem:[#allocation8 + $0x148] sm:$0xff]  ;;  %v4089_v47 = vcombine.low %v223_v35, %v227_v36 }
  0x57   :  { %3283 = vmatprep.subr.bf16.mxu0 %v4074_v25  ;;  %3455 = vmatprep.subr.bf16.mxu1 %v4076_v26  ;;  %v235_v44 = vld [vmem:[#allocation8 + $0x160] sm:$0xff]  ;;  %v236_v46 = vld [vmem:[#allocation8 + $0x168] sm:$0xff]  ;;  %v4091_v48 = vcombine.low %v224_v37, %v228_v38 }
  0x58   :  { %v4098_v49 = vcombine.high %v231_v43, %v235_v44  ;;  %v4100_v50 = vcombine.high %v232_v45, %v236_v46  ;;  %v239_v51 = vld [vmem:[#allocation8 + $0x180] sm:$0xff]  ;;  %v240_v53 = vld [vmem:[#allocation8 + $0x188] sm:$0xff]  ;;  %v4097_v55 = vcombine.low %v231_v43, %v235_v44  ;;  %v4099_v56 = vcombine.low %v232_v45, %v236_v46 }
  0x59   :  { %v243_v52 = vld [vmem:[#allocation8 + $0x1a0] sm:$0xff]  ;;  %v244_v54 = vld [vmem:[#allocation8 + $0x1a8] sm:$0xff] }
  0x5a   :  { %3284 = vmatpush1.bf16.msra.mxu0 %v4073_v31  ;;  %3456 = vmatpush1.bf16.msra.mxu1 %v4075_v32  ;;  %v4106_v57 = vcombine.high %v239_v51, %v243_v52  ;;  %v247_v58 = vld [vmem:[#allocation8 + $0x1c0] sm:$0xff]  ;;  %v4108_v60 = vcombine.high %v240_v53, %v244_v54  ;;  %v4895_v63 = vld [vmem:[#allocation8 + $0x408] sm:$0xff]  ;;  %v4105_v4 = vcombine.low %v239_v51, %v243_v52 }
  0x5b   :  { %3285 = vmatprep.subr.bf16.mxu0 %v4082_v33  ;;  %3457 = vmatprep.subr.bf16.mxu1 %v4084_v34  ;;  %v251_v59 = vld [vmem:[#allocation8 + $0x1e0] sm:$0xff]  ;;  %v248_v0 = vld [vmem:[#allocation8 + $0x1c8] sm:$0xff]  ;;  %v4107_v6 = vcombine.low %v240_v53, %v244_v54 }
  0x5c   :  { %v4891_v61 = vld [vmem:[#allocation8 + $0x400] sm:$0xff]  ;;  %v252_v1 = vld [vmem:[#allocation8 + $0x1e8] sm:$0xff]  ;;  %v4114_v7 = vcombine.high %v247_v58, %v251_v59  ;;  %v4113_v13 = vcombine.low %v247_v58, %v251_v59 }
  0x5d   :  { %v4893_v62 = vld [vmem:[#allocation8 + $0x420] sm:$0xff]  ;;  %v4899_v3 = vld [vmem:[#allocation8 + $0x428] sm:$0xff]  ;;  %v4116_v8 = vcombine.high %v248_v0, %v252_v1  ;;  %v4115_v14 = vcombine.low %v248_v0, %v252_v1 }
  0x5e   :  { %3286 = vmatpush1.bf16.msra.mxu0 %v4081_v39  ;;  %3458 = vmatpush1.bf16.msra.mxu1 %v4083_v40  ;;  %v4185_v2 = vcombine.low %v4891_v61, %v4893_v62  ;;  %v4187_v5 = vcombine.low %v4895_v63, %v4899_v3  ;;  %v255_v9 = vld [vmem:[#allocation8 + $0x200] sm:$0xff]  ;;  %v256_v11 = vld [vmem:[#allocation8 + $0x208] sm:$0xff] }
  0x5f   :  { %3287 = vmatprep.subr.bf16.mxu0 %v4090_v41  ;;  %3459 = vmatprep.subr.bf16.mxu1 %v4092_v42  ;;  %v259_v10 = vld [vmem:[#allocation8 + $0x220] sm:$0xff]  ;;  %v260_v12 = vld [vmem:[#allocation8 + $0x228] sm:$0xff] }
  0x60   :  { %v4122_v15 = vcombine.high %v255_v9, %v259_v10  ;;  %v4124_v16 = vcombine.high %v256_v11, %v260_v12  ;;  %v263_v17 = vld [vmem:[#allocation8 + $0x240] sm:$0xff]  ;;  %v264_v19 = vld [vmem:[#allocation8 + $0x248] sm:$0xff]  ;;  %v4121_v21 = vcombine.low %v255_v9, %v259_v10  ;;  %v4123_v22 = vcombine.low %v256_v11, %v260_v12 }
  0x61   :  { %v267_v18 = vld [vmem:[#allocation8 + $0x260] sm:$0xff]  ;;  %v268_v20 = vld [vmem:[#allocation8 + $0x268] sm:$0xff] }
  0x62   :  { %3288 = vmatpush1.bf16.msra.mxu0 %v4089_v47  ;;  %3460 = vmatpush1.bf16.msra.mxu1 %v4091_v48  ;;  %v4130_v23 = vcombine.high %v263_v17, %v267_v18  ;;  %v4132_v24 = vcombine.high %v264_v19, %v268_v20  ;;  %v271_v25 = vld [vmem:[#allocation8 + $0x280] sm:$0xff]  ;;  %v272_v27 = vld [vmem:[#allocation8 + $0x288] sm:$0xff]  ;;  %v4129_v29 = vcombine.low %v263_v17, %v267_v18 }
  0x63   :  { %3289 = vmatprep.subr.bf16.mxu0 %v4098_v49  ;;  %3461 = vmatprep.subr.bf16.mxu1 %v4100_v50  ;;  %v275_v26 = vld [vmem:[#allocation8 + $0x2a0] sm:$0xff]  ;;  %v276_v28 = vld [vmem:[#allocation8 + $0x2a8] sm:$0xff]  ;;  %v4131_v30 = vcombine.low %v264_v19, %v268_v20  ;;  %v4186_v17 = vcombine.high %v4891_v61, %v4893_v62  ;;  %v4188_v18 = vcombine.high %v4895_v63, %v4899_v3 }
  0x64   :  { %v4138_v31 = vcombine.high %v271_v25, %v275_v26  ;;  %v4140_v32 = vcombine.high %v272_v27, %v276_v28  ;;  %v279_v33 = vld [vmem:[#allocation8 + $0x2c0] sm:$0xff]  ;;  %v280_v35 = vld [vmem:[#allocation8 + $0x2c8] sm:$0xff]  ;;  %v4137_v37 = vcombine.low %v271_v25, %v275_v26  ;;  %v4139_v38 = vcombine.low %v272_v27, %v276_v28  ;;  %v84_v28 = vld [vmem:[#allocation2 + $0x18] sm:$0xff] }
  0x65   :  { %v283_v34 = vld [vmem:[#allocation8 + $0x2e0] sm:$0xff]  ;;  %v284_v36 = vld [vmem:[#allocation8 + $0x2e8] sm:$0xff] }
  0x66   :  { %3290 = vmatpush1.bf16.msra.mxu0 %v4097_v55  ;;  %3462 = vmatpush1.bf16.msra.mxu1 %v4099_v56  ;;  %v4146_v39 = vcombine.high %v279_v33, %v283_v34  ;;  %v4148_v40 = vcombine.high %v280_v35, %v284_v36  ;;  %v287_v41 = vld [vmem:[#allocation8 + $0x300] sm:$0xff]  ;;  %v288_v43 = vld [vmem:[#allocation8 + $0x308] sm:$0xff]  ;;  %v4145_v45 = vcombine.low %v279_v33, %v283_v34 }
  0x67   :  { %3291 = vmatprep.subr.bf16.mxu0 %v4106_v57  ;;  %3463 = vmatprep.subr.bf16.mxu1 %v4108_v60  ;;  %v291_v42 = vld [vmem:[#allocation8 + $0x320] sm:$0xff]  ;;  %v292_v44 = vld [vmem:[#allocation8 + $0x328] sm:$0xff]  ;;  %v4147_v46 = vcombine.low %v280_v35, %v284_v36 }
  0x68   :  { %v4154_v47 = vcombine.high %v287_v41, %v291_v42  ;;  %v4156_v48 = vcombine.high %v288_v43, %v292_v44  ;;  %v295_v49 = vld [vmem:[#allocation8 + $0x340] sm:$0xff]  ;;  %v296_v51 = vld [vmem:[#allocation8 + $0x348] sm:$0xff]  ;;  %v4153_v53 = vcombine.low %v287_v41, %v291_v42  ;;  %v4155_v54 = vcombine.low %v288_v43, %v292_v44  ;;  %v136_v44 = vld [vmem:[#allocation5 + $0x58] sm:$0xff] }
  0x69   :  { %v299_v50 = vld [vmem:[#allocation8 + $0x360] sm:$0xff]  ;;  %v300_v52 = vld [vmem:[#allocation8 + $0x368] sm:$0xff] }
  0x6a   :  { %3292 = vmatpush1.bf16.msra.mxu0 %v4105_v4  ;;  %3464 = vmatpush1.bf16.msra.mxu1 %v4107_v6  ;;  %v4162_v55 = vcombine.high %v295_v49, %v299_v50  ;;  %v4164_v56 = vcombine.high %v296_v51, %v300_v52  ;;  %v303_v57 = vld [vmem:[#allocation8 + $0x380] sm:$0xff]  ;;  %v304_v59 = vld [vmem:[#allocation8 + $0x388] sm:$0xff]  ;;  %v4161_v0 = vcombine.low %v295_v49, %v299_v50 }
  0x6b   :  { %3293 = vmatprep.subr.bf16.mxu0 %v4114_v7  ;;  %3465 = vmatprep.subr.bf16.mxu1 %v4116_v8  ;;  %v307_v58 = vld [vmem:[#allocation8 + $0x3a0] sm:$0xff]  ;;  %v308_v60 = vld [vmem:[#allocation8 + $0x3a8] sm:$0xff]  ;;  %v4163_v1 = vcombine.low %v296_v51, %v300_v52 }
  0x6c   :  { %v4170_v4 = vcombine.high %v303_v57, %v307_v58  ;;  %v4172_v6 = vcombine.high %v304_v59, %v308_v60  ;;  %v311_v7 = vld [vmem:[#allocation8 + $0x3c0] sm:$0xff]  ;;  %v312_v9 = vld [vmem:[#allocation8 + $0x3c8] sm:$0xff]  ;;  %v4169_v11 = vcombine.low %v303_v57, %v307_v58  ;;  %v4171_v12 = vcombine.low %v304_v59, %v308_v60 }
  0x6d   :  { %v315_v8 = vld [vmem:[#allocation8 + $0x3e0] sm:$0xff]  ;;  %v316_v10 = vld [vmem:[#allocation8 + $0x3e8] sm:$0xff] }
  0x6e   :  { %3294 = vmatpush1.bf16.msra.mxu0 %v4113_v13  ;;  %3466 = vmatpush1.bf16.msra.mxu1 %v4115_v14  ;;  %v4178_v13 = vcombine.high %v311_v7, %v315_v8  ;;  %v4180_v14 = vcombine.high %v312_v9, %v316_v10  ;;  %v82_v19 = vld [vmem:[#allocation2 + $0x8] sm:$0xff]  ;;  %v347_v62 = vld [vmem:[#allocation8 + $0x4e0] sm:$0xff] }
  0x6f   :  { %3295 = vmatprep.subr.bf16.mxu0 %v4122_v15  ;;  %3467 = vmatprep.subr.bf16.mxu1 %v4124_v16  ;;  %v4177_v15 = vcombine.low %v311_v7, %v315_v8  ;;  %v4179_v16 = vcombine.low %v312_v9, %v316_v10  ;;  %v126_v20 = vld [vmem:[#allocation5 + $0x8] sm:$0xff]  ;;  %v4933_v8 = vld [vmem:[#allocation8 + $0x440] sm:$0xff] }
  0x70   :  { %v90_v27 = vld [vmem:[#allocation2 + $0x48] sm:$0xff]  ;;  %v331_v9 = vld [vmem:[#allocation8 + $0x460] sm:$0xff] }
  0x71   :  { %v86_v35 = vld [vmem:[#allocation2 + $0x28] sm:$0xff] }
  0x72   :  { %3296 = vmatpush1.bf16.msra.mxu0 %v4121_v21  ;;  %3468 = vmatpush1.bf16.msra.mxu1 %v4123_v22  ;;  %v81_v21 = vld [vmem:[#allocation2] sm:$0xff]  ;;  %v130_v36 = vld [vmem:[#allocation5 + $0x28] sm:$0xff] }
  0x73   :  { %3297 = vmatprep.subr.bf16.mxu0 %v4130_v23  ;;  %3469 = vmatprep.subr.bf16.mxu1 %v4132_v24  ;;  %v125_v22 = vld [vmem:[#allocation5] sm:$0xff]  ;;  %v83_v23 = vld [vmem:[#allocation2 + $0x10] sm:$0xff]  ;;  %v94_v52 = vld [vmem:[#allocation2 + $0x68] sm:$0xff] }
  0x74   :  { %v127_v24 = vld [vmem:[#allocation5 + $0x10] sm:$0xff] }
  0x76   :  { %3298 = vmatpush1.bf16.msra.mxu0 %v4129_v29  ;;  %3470 = vmatpush1.bf16.msra.mxu1 %v4131_v30  ;;  %v128_v29 = vld [vmem:[#allocation5 + $0x18] sm:$0xff] }
  0x77   :  { %3299 = vmatprep.subr.bf16.mxu0 %v4138_v31  ;;  %3471 = vmatprep.subr.bf16.mxu1 %v4140_v32  ;;  %v134_v31 = vld [vmem:[#allocation5 + $0x48] sm:$0xff] }
  0x7a   :  { %3300 = vmatpush1.bf16.msra.mxu0 %v4137_v37  ;;  %3472 = vmatpush1.bf16.msra.mxu1 %v4139_v38  ;;  %v89_v37 = vld [vmem:[#allocation2 + $0x40] sm:$0xff] }
  0x7b   :  { %3301 = vmatprep.subr.bf16.mxu0 %v4146_v39  ;;  %3473 = vmatprep.subr.bf16.mxu1 %v4148_v40  ;;  %v133_v38 = vld [vmem:[#allocation5 + $0x40] sm:$0xff]  ;;  %v92_v39 = vld [vmem:[#allocation2 + $0x58] sm:$0xff] }
  0x7e   :  { %3302 = vmatpush1.bf16.msra.mxu0 %v4145_v45  ;;  %3474 = vmatpush1.bf16.msra.mxu1 %v4147_v46  ;;  %v91_v46 = vld [vmem:[#allocation2 + $0x50] sm:$0xff] }
  0x7f   :  { %3303 = vmatprep.subr.bf16.mxu0 %v4154_v47  ;;  %3475 = vmatprep.subr.bf16.mxu1 %v4156_v48  ;;  %v135_v47 = vld [vmem:[#allocation5 + $0x50] sm:$0xff] }
  0x82   :  { %3304 = vmatpush1.bf16.msra.mxu0 %v4153_v53  ;;  %3476 = vmatpush1.bf16.msra.mxu1 %v4155_v54  ;;  %v138_v54 = vld [vmem:[#allocation5 + $0x68] sm:$0xff] }
  0x83   :  { %3305 = vmatprep.subr.bf16.mxu0 %v4162_v55  ;;  %3477 = vmatprep.subr.bf16.mxu1 %v4164_v56 }
  0x86   :  { %3306 = vmatpush1.bf16.msra.mxu0 %v4161_v0  ;;  %3478 = vmatpush1.bf16.msra.mxu1 %v4163_v1 }
  0x87   :  { %3307 = vmatprep.subr.bf16.mxu0 %v4170_v4  ;;  %3479 = vmatprep.subr.bf16.mxu1 %v4172_v6 }
  0x8a   :  { %3308 = vmatpush1.bf16.msra.mxu0 %v4169_v11  ;;  %3480 = vmatpush1.bf16.msra.mxu1 %v4171_v12 }
  0x8b   :  { %3309 = vmatprep.subr.bf16.mxu0 %v4178_v13  ;;  %3481 = vmatprep.subr.bf16.mxu1 %v4180_v14  ;;  %v328_v13 = vld [vmem:[#allocation8 + $0x448] sm:$0xff] }
  0x8c   :  { %v332_v14 = vld [vmem:[#allocation8 + $0x468] sm:$0xff] }
  0x8e   :  { %3310 = vmatpush1.bf16.msra.mxu0 %v4177_v15  ;;  %3482 = vmatpush1.bf16.msra.mxu1 %v4179_v16 }
  0x8f   :  { %3322 = vmatprep.subr.bf16.mxu0 %v4186_v17  ;;  %3494 = vmatprep.subr.bf16.mxu1 %v4188_v18 }
  0xcb   :  { %v4907_v25 = vpop.permute.xlu1 %143  ;;  %v4909_v26 = vpop.permute.xlu0 %99 }
  0xcc   :  { %v108_v30 = vmul.f32 %v4909_v26, %v82_v19  ;;  %v152_v32 = vmul.f32 %v4907_v25, %v126_v20  ;;  %v107_v33 = vmul.f32 %v4909_v26, %v81_v21  ;;  %v151_v34 = vmul.f32 %v4907_v25, %v125_v22  ;;  %v85_v21 = vld [vmem:[#allocation2 + $0x20] sm:$0xff] }
  0xcd   :  { %v109_v40 = vmul.f32 %v4909_v26, %v83_v23  ;;  %v153_v41 = vmul.f32 %v4907_v25, %v127_v24  ;;  %v110_v43 = vmul.f32 %v4909_v26, %v84_v28  ;;  %v154_v45 = vmul.f32 %v4907_v25, %v128_v29  ;;  %v93_v22 = vld [vmem:[#allocation2 + $0x60] sm:$0xff] }
  0xce   :  { %v168_v42 = vadd.f32 %v152_v32, %v108_v30  ;;  %v167_v50 = vadd.f32 %v151_v34, %v107_v33  ;;  %v112_v53 = vmul.f32 %v4909_v26, %v86_v35  ;;  %v156_v55 = vmul.f32 %v4907_v25, %v130_v36  ;;  %v129_v23 = vld [vmem:[#allocation5 + $0x20] sm:$0xff]  ;;  %v336_v33 = vld [vmem:[#allocation8 + $0x488] sm:$0xff] }
  0xcf   :  { %v4919_v48 = vpop.permute.xlu1 %148  ;;  %v169_v51 = vadd.f32 %v153_v41, %v109_v40  ;;  %v170_v19 = vadd.f32 %v154_v45, %v110_v43  ;;  %v4194_v24 = vcombine.high %v4933_v8, %v331_v9  ;;  %v137_v29 = vld [vmem:[#allocation5 + $0x60] sm:$0xff]  ;;  %v340_v34 = vld [vmem:[#allocation8 + $0x4a8] sm:$0xff]  ;;  %v111_v36 = vmul.f32 %v4909_v26, %v85_v21  ;;  %v96_v40 = vld [vmem:[#allocation2 + $0x78] sm:$0xff] }
  0xd0   :  { %v4921_v49 = vpop.permute.xlu0 %104  ;;  %v160_v57 = vmul.f32 %v4919_v48, %v134_v31  ;;  %v159_v59 = vmul.f32 %v4919_v48, %v133_v38  ;;  %v162_v0 = vmul.f32 %v4919_v48, %v136_v44  ;;  %v161_v4 = vmul.f32 %v4919_v48, %v135_v47  ;;  %v339_v32 = vld [vmem:[#allocation8 + $0x4a0] sm:$0xff]  ;;  %v132_v45 = vld [vmem:[#allocation5 + $0x38] sm:$0xff] }
  0xd1   :  { %v116_v56 = vmul.f32 %v4921_v49, %v90_v27  ;;  %v115_v58 = vmul.f32 %v4921_v49, %v89_v37  ;;  %v118_v60 = vmul.f32 %v4921_v49, %v92_v39  ;;  %v117_v1 = vmul.f32 %v4921_v49, %v91_v46  ;;  %v4942_v27 = vld [vmem:[#allocation8 + $0x480] sm:$0xff]  ;;  %v88_v39 = vld [vmem:[#allocation2 + $0x38] sm:$0xff] }
  0xd2   :  { %v120_v10 = vmul.f32 %v4921_v49, %v94_v52  ;;  %v164_v11 = vmul.f32 %v4919_v48, %v138_v54  ;;  %v172_v16 = vadd.f32 %v156_v55, %v112_v53  ;;  %v4196_v31 = vcombine.high %v328_v13, %v332_v14  ;;  %v343_v43 = vld [vmem:[#allocation8 + $0x4c0] sm:$0xff]  ;;  %v140_v46 = vld [vmem:[#allocation5 + $0x78] sm:$0xff]  ;;  %v87_v52 = vld [vmem:[#allocation2 + $0x30] sm:$0xff] }
  0xd3   :  { %v176_v6 = vadd.f32 %v160_v57, %v116_v56  ;;  %v175_v7 = vadd.f32 %v159_v59, %v115_v58  ;;  %v178_v12 = vadd.f32 %v162_v0, %v118_v60  ;;  %v177_v15 = vadd.f32 %v161_v4, %v117_v1  ;;  %v95_v57 = vld [vmem:[#allocation2 + $0x70] sm:$0xff]  ;;  %v351_v4 = vld [vmem:[#allocation8 + $0x500] sm:$0xff] }
  0xd4   :  { %v180_v20 = vadd.f32 %v164_v11, %v120_v10  ;;  %v119_v37 = vmul.f32 %v4921_v49, %v93_v22  ;;  %v155_v38 = vmul.f32 %v4907_v25, %v129_v23  ;;  %v4193_v41 = vcombine.low %v4933_v8, %v331_v9  ;;  %v131_v58 = vld [vmem:[#allocation5 + $0x30] sm:$0xff]  ;;  %v355_v9 = vld [vmem:[#allocation8 + $0x520] sm:$0xff]  ;;  %v352_v10 = vld [vmem:[#allocation8 + $0x508] sm:$0xff] }
  0xd5   :  { %v4937_v17 = vpack.c.bf16 %v176_v6, %v168_v42  ;;  %v4939_v18 = vpack.c.bf16 %v175_v7, %v167_v50  ;;  %v4944_v28 = vpack.c.bf16 %v177_v15, %v169_v51  ;;  %v4948_v30 = vpack.c.bf16 %v178_v12, %v170_v19  ;;  %v348_v50 = vld [vmem:[#allocation8 + $0x4e8] sm:$0xff]  ;;  %v139_v1 = vld [vmem:[#allocation5 + $0x70] sm:$0xff]  ;;  %v359_v22 = vld [vmem:[#allocation8 + $0x540] sm:$0xff] }
  0xd6   :  { %v4950_v35 = vpack.c.bf16 %v180_v20, %v172_v16  ;;  %v4195_v42 = vcombine.low %v328_v13, %v332_v14  ;;  %v163_v44 = vmul.f32 %v4919_v48, %v137_v29  ;;  %v4202_v47 = vcombine.high %v4942_v27, %v339_v32  ;;  %v356_v11 = vld [vmem:[#allocation8 + $0x528] sm:$0xff] }
  0xd7   :  { %3311 = vmatprep.mubr.bf16.mxu0 %v4937_v17  ;;  %3483 = vmatprep.mubr.bf16.mxu1 %v4937_v17  ;;  %v4204_v61 = vcombine.high %v336_v33, %v340_v34  ;;  %v171_v63 = vadd.f32 %v155_v38, %v111_v36  ;;  %v122_v51 = vmul.f32 %v4921_v49, %v96_v40  ;;  %v368_v36 = vld [vmem:[#allocation8 + $0x588] sm:$0xff] }
  0xd8   :  { %3312 = vmatmul.mubr.bf16.vlgmr.msra.gmra.mrb[0].mxu0 %v4939_v18  ;;  %3484 = vmatmul.mubr.bf16.vlgmr.msra.gmra.mrb[0].mxu1 %v4939_v18  ;;  %v179_v3 = vadd.f32 %v163_v44, %v119_v37  ;;  %v4201_v53 = vcombine.low %v4942_v27, %v339_v32  ;;  %v4203_v54 = vcombine.low %v336_v33, %v340_v34  ;;  %v360_v27 = vld [vmem:[#allocation8 + $0x548] sm:$0xff]  ;;  %v367_v33 = vld [vmem:[#allocation8 + $0x580] sm:$0xff] }
  0xd9   :  { %3323 = vmatpush1.bf16.msra.mxu0 %v4185_v2  ;;  %3495 = vmatpush1.bf16.msra.mxu1 %v4187_v5  ;;  %v344_v2 = vld [vmem:[#allocation8 + $0x4c8] sm:$0xff]  ;;  %v114_v5 = vmul.f32 %v4909_v26, %v88_v39  ;;  %v158_v55 = vmul.f32 %v4907_v25, %v132_v45  ;;  %v166_v56 = vmul.f32 %v4919_v48, %v140_v46  ;;  %v371_v34 = vld [vmem:[#allocation8 + $0x5a0] sm:$0xff] }
  0xda   :  { %3354 = vmatprep.mubr.bf16.mxu0 %v4948_v30  ;;  %3526 = vmatprep.mubr.bf16.mxu1 %v4948_v30  ;;  %v4210_v59 = vcombine.high %v343_v43, %v347_v62  ;;  %v4212_v60 = vcombine.high %v344_v2, %v348_v50  ;;  %v4973_v0 = vpack.c.bf16 %v179_v3, %v171_v63  ;;  %v372_v37 = vld [vmem:[#allocation8 + $0x5a8] sm:$0xff] }
  0xdb   :  { %3324 = vmatprep.subr.bf16.mxu0 %v4194_v24  ;;  %3496 = vmatprep.subr.bf16.mxu1 %v4196_v31  ;;  %v174_v6 = vadd.f32 %v158_v55, %v114_v5  ;;  %v182_v7 = vadd.f32 %v166_v56, %v122_v51  ;;  %v113_v8 = vmul.f32 %v4909_v26, %v87_v52  ;;  %v363_v24 = vld [vmem:[#allocation8 + $0x560] sm:$0xff]  ;;  %v376_v44 = vld [vmem:[#allocation8 + $0x5c8] sm:$0xff] }
  0xdc   :  { %v121_v12 = vmul.f32 %v4921_v49, %v95_v57  ;;  %v157_v13 = vmul.f32 %v4907_v25, %v131_v58  ;;  %v165_v15 = vmul.f32 %v4919_v48, %v139_v1  ;;  %v4209_v16 = vcombine.low %v343_v43, %v347_v62  ;;  %v364_v49 = vld [vmem:[#allocation8 + $0x568] sm:$0xff]  ;;  %v379_v43 = vld [vmem:[#allocation8 + $0x5e0] sm:$0xff] }
  0xdd   :  { %3325 = vmatpush1.bf16.msra.mxu0 %v4193_v41  ;;  %3497 = vmatpush1.bf16.msra.mxu1 %v4195_v42  ;;  %v4978_v14 = vpack.c.bf16 %v182_v7, %v174_v6  ;;  %v4211_v19 = vcombine.low %v344_v2, %v348_v50  ;;  %v4218_v21 = vcombine.high %v351_v4, %v355_v9  ;;  %v375_v42 = vld [vmem:[#allocation8 + $0x5c0] sm:$0xff]  ;;  %v380_v45 = vld [vmem:[#allocation8 + $0x5e8] sm:$0xff] }
  0xde   :  { %3326 = vmatprep.subr.bf16.mxu0 %v4202_v47  ;;  %3498 = vmatprep.subr.bf16.mxu1 %v4204_v61  ;;  %v173_v20 = vadd.f32 %v157_v13, %v113_v8  ;;  %v4220_v26 = vcombine.high %v352_v10, %v356_v11  ;;  %v181_v23 = vadd.f32 %v165_v15, %v121_v12  ;;  %v383_v2 = vld [vmem:[#allocation8 + $0x600] sm:$0xff]  ;;  %v384_v63 = vld [vmem:[#allocation8 + $0x608] sm:$0xff] }
  0xdf   :  { %v4217_v25 = vcombine.low %v351_v4, %v355_v9  ;;  %v4219_v48 = vcombine.low %v352_v10, %v356_v11  ;;  %v4226_v31 = vcombine.high %v359_v22, %v363_v24  ;;  %v4228_v32 = vcombine.high %v360_v27, %v364_v49  ;;  %v387_v50 = vld [vmem:[#allocation8 + $0x620] sm:$0xff]  ;;  %v388_v3 = vld [vmem:[#allocation8 + $0x628] sm:$0xff] }
  0xe0   :  { %v4981_v29 = vpack.c.bf16 %v181_v23, %v173_v20  ;;  %v4225_v38 = vcombine.low %v359_v22, %v363_v24  ;;  %v4227_v39 = vcombine.low %v360_v27, %v364_v49  ;;  %v4234_v40 = vcombine.high %v367_v33, %v371_v34  ;;  %v395_v55 = vld [vmem:[#allocation8 + $0x660] sm:$0xff]  ;;  %v392_v56 = vld [vmem:[#allocation8 + $0x648] sm:$0xff] }
  0xe1   :  { %3327 = vmatpush1.bf16.msra.mxu0 %v4201_v53  ;;  %3499 = vmatpush1.bf16.msra.mxu1 %v4203_v54  ;;  %v4236_v41 = vcombine.high %v368_v36, %v372_v37  ;;  %v4233_v46 = vcombine.low %v367_v33, %v371_v34  ;;  %v4235_v47 = vcombine.low %v368_v36, %v372_v37  ;;  %v391_v54 = vld [vmem:[#allocation8 + $0x640] sm:$0xff]  ;;  %v396_v57 = vld [vmem:[#allocation8 + $0x668] sm:$0xff] }
  0xe2   :  { %3328 = vmatprep.subr.bf16.mxu0 %v4210_v59  ;;  %3500 = vmatprep.subr.bf16.mxu1 %v4212_v60  ;;  %v4242_v61 = vcombine.high %v375_v42, %v379_v43  ;;  %v4244_v62 = vcombine.high %v376_v44, %v380_v45  ;;  %v4241_v5 = vcombine.low %v375_v42, %v379_v43  ;;  %v399_v4 = vld [vmem:[#allocation8 + $0x680] sm:$0xff]  ;;  %v400_v7 = vld [vmem:[#allocation8 + $0x688] sm:$0xff] }
  0xe3   :  { %v4243_v51 = vcombine.low %v376_v44, %v380_v45  ;;  %v4250_v52 = vcombine.high %v383_v2, %v387_v50  ;;  %v4252_v53 = vcombine.high %v384_v63, %v388_v3  ;;  %v4249_v58 = vcombine.low %v383_v2, %v387_v50  ;;  %v403_v6 = vld [vmem:[#allocation8 + $0x6a0] sm:$0xff]  ;;  %v404_v8 = vld [vmem:[#allocation8 + $0x6a8] sm:$0xff] }
  0xe4   :  { %v4251_v59 = vcombine.low %v384_v63, %v388_v3  ;;  %v4258_v60 = vcombine.high %v391_v54, %v395_v55  ;;  %v4260_v1 = vcombine.high %v392_v56, %v396_v57  ;;  %v4257_v9 = vcombine.low %v391_v54, %v395_v55  ;;  %v407_v13 = vld [vmem:[#allocation8 + $0x6c0] sm:$0xff]  ;;  %v416_v27 = vld [vmem:[#allocation8 + $0x708] sm:$0xff] }
  0xe5   :  { %3329 = vmatpush1.bf16.msra.mxu0 %v4209_v16  ;;  %3501 = vmatpush1.bf16.msra.mxu1 %v4211_v19  ;;  %v4259_v10 = vcombine.low %v392_v56, %v396_v57  ;;  %v4266_v11 = vcombine.high %v399_v4, %v403_v6  ;;  %v4268_v12 = vcombine.high %v400_v7, %v404_v8  ;;  %v411_v15 = vld [vmem:[#allocation8 + $0x6e0] sm:$0xff]  ;;  %v408_v16 = vld [vmem:[#allocation8 + $0x6c8] sm:$0xff] }
  0xe6   :  { %3330 = vmatprep.subr.bf16.mxu0 %v4218_v21  ;;  %3502 = vmatprep.subr.bf16.mxu1 %v4220_v26  ;;  %v412_v19 = vld [vmem:[#allocation8 + $0x6e8] sm:$0xff]  ;;  %v4265_v20 = vcombine.low %v399_v4, %v403_v6  ;;  %v4267_v21 = vcombine.low %v400_v7, %v404_v8  ;;  %v4274_v26 = vcombine.high %v407_v13, %v411_v15  ;;  %v415_v23 = vld [vmem:[#allocation8 + $0x700] sm:$0xff] }
  0xe7   :  { %v4276_v22 = vcombine.high %v408_v16, %v412_v19  ;;  %v419_v24 = vld [vmem:[#allocation8 + $0x720] sm:$0xff]  ;;  %v420_v49 = vld [vmem:[#allocation8 + $0x728] sm:$0xff] }
  0xe8   :  { %v423_v33 = vld [vmem:[#allocation8 + $0x740] sm:$0xff]  ;;  %v424_v36 = vld [vmem:[#allocation8 + $0x748] sm:$0xff] }
  0xe9   :  { %3331 = vmatpush1.bf16.msra.mxu0 %v4217_v25  ;;  %3503 = vmatpush1.bf16.msra.mxu1 %v4219_v48  ;;  %v4273_v25 = vcombine.low %v407_v13, %v411_v15  ;;  %v4275_v48 = vcombine.low %v408_v16, %v412_v19  ;;  %v427_v34 = vld [vmem:[#allocation8 + $0x760] sm:$0xff]  ;;  %v428_v37 = vld [vmem:[#allocation8 + $0x768] sm:$0xff] }
  0xea   :  { %3332 = vmatprep.subr.bf16.mxu0 %v4226_v31  ;;  %3504 = vmatprep.subr.bf16.mxu1 %v4228_v32  ;;  %v4282_v31 = vcombine.high %v415_v23, %v419_v24  ;;  %v4284_v32 = vcombine.high %v416_v27, %v420_v49  ;;  %v431_v42 = vld [vmem:[#allocation8 + $0x780] sm:$0xff]  ;;  %v432_v44 = vld [vmem:[#allocation8 + $0x788] sm:$0xff] }
  0xeb   :  { %v435_v43 = vld [vmem:[#allocation8 + $0x7a0] sm:$0xff]  ;;  %v436_v45 = vld [vmem:[#allocation8 + $0x7a8] sm:$0xff] }
  0xec   :  { %v439_v2 = vld [vmem:[#allocation8 + $0x7c0] sm:$0xff]  ;;  %v440_v63 = vld [vmem:[#allocation8 + $0x7c8] sm:$0xff] }
  0xed   :  { %3333 = vmatpush1.bf16.msra.mxu0 %v4225_v38  ;;  %3505 = vmatpush1.bf16.msra.mxu1 %v4227_v39  ;;  %v4281_v38 = vcombine.low %v415_v23, %v419_v24  ;;  %v4283_v39 = vcombine.low %v416_v27, %v420_v49  ;;  %v443_v50 = vld [vmem:[#allocation8 + $0x7e0] sm:$0xff]  ;;  %v444_v3 = vld [vmem:[#allocation8 + $0x7e8] sm:$0xff] }
  0xee   :  { %3334 = vmatprep.subr.bf16.mxu0 %v4234_v40  ;;  %3506 = vmatprep.subr.bf16.mxu1 %v4236_v41  ;;  %v4290_v40 = vcombine.high %v423_v33, %v427_v34  ;;  %v4292_v41 = vcombine.high %v424_v36, %v428_v37  ;;  %v447_v54 = vld [vmem:[#allocation8 + $0x800] sm:$0xff]  ;;  %v448_v56 = vld [vmem:[#allocation8 + $0x808] sm:$0xff] }
  0xef   :  { %v451_v55 = vld [vmem:[#allocation8 + $0x820] sm:$0xff]  ;;  %v452_v57 = vld [vmem:[#allocation8 + $0x828] sm:$0xff] }
  0xf0   :  { %v455_v4 = vld [vmem:[#allocation8 + $0x840] sm:$0xff]  ;;  %v456_v7 = vld [vmem:[#allocation8 + $0x848] sm:$0xff] }
  0xf1   :  { %3335 = vmatpush1.bf16.msra.mxu0 %v4233_v46  ;;  %3507 = vmatpush1.bf16.msra.mxu1 %v4235_v47  ;;  %v4289_v46 = vcombine.low %v423_v33, %v427_v34  ;;  %v4291_v47 = vcombine.low %v424_v36, %v428_v37  ;;  %v459_v6 = vld [vmem:[#allocation8 + $0x860] sm:$0xff]  ;;  %v460_v8 = vld [vmem:[#allocation8 + $0x868] sm:$0xff] }
  0xf2   :  { %3336 = vmatprep.subr.bf16.mxu0 %v4242_v61  ;;  %3508 = vmatprep.subr.bf16.mxu1 %v4244_v62  ;;  %v4298_v61 = vcombine.high %v431_v42, %v435_v43  ;;  %v4300_v62 = vcombine.high %v432_v44, %v436_v45  ;;  %v463_v13 = vld [vmem:[#allocation8 + $0x880] sm:$0xff]  ;;  %v464_v16 = vld [vmem:[#allocation8 + $0x888] sm:$0xff] }
  0xf3   :  { %v467_v15 = vld [vmem:[#allocation8 + $0x8a0] sm:$0xff]  ;;  %v468_v19 = vld [vmem:[#allocation8 + $0x8a8] sm:$0xff] }
  0xf4   :  { %v471_v23 = vld [vmem:[#allocation8 + $0x8c0] sm:$0xff]  ;;  %v472_v27 = vld [vmem:[#allocation8 + $0x8c8] sm:$0xff] }
  0xf5   :  { %3337 = vmatpush1.bf16.msra.mxu0 %v4241_v5  ;;  %3509 = vmatpush1.bf16.msra.mxu1 %v4243_v51  ;;  %v4297_v5 = vcombine.low %v431_v42, %v435_v43  ;;  %v4299_v51 = vcombine.low %v432_v44, %v436_v45  ;;  %v475_v24 = vld [vmem:[#allocation8 + $0x8e0] sm:$0xff]  ;;  %v476_v49 = vld [vmem:[#allocation8 + $0x8e8] sm:$0xff] }
  0xf6   :  { %3338 = vmatprep.subr.bf16.mxu0 %v4250_v52  ;;  %3510 = vmatprep.subr.bf16.mxu1 %v4252_v53  ;;  %v4306_v52 = vcombine.high %v439_v2, %v443_v50  ;;  %v4308_v53 = vcombine.high %v440_v63, %v444_v3  ;;  %v479_v33 = vld [vmem:[#allocation8 + $0x900] sm:$0xff]  ;;  %v480_v36 = vld [vmem:[#allocation8 + $0x908] sm:$0xff] }
  0xf7   :  { %v483_v34 = vld [vmem:[#allocation8 + $0x920] sm:$0xff]  ;;  %v484_v37 = vld [vmem:[#allocation8 + $0x928] sm:$0xff] }
  0xf8   :  { %v487_v42 = vld [vmem:[#allocation8 + $0x940] sm:$0xff]  ;;  %v488_v44 = vld [vmem:[#allocation8 + $0x948] sm:$0xff] }
  0xf9   :  { %3339 = vmatpush1.bf16.msra.mxu0 %v4249_v58  ;;  %3511 = vmatpush1.bf16.msra.mxu1 %v4251_v59  ;;  %v4305_v58 = vcombine.low %v439_v2, %v443_v50  ;;  %v4307_v59 = vcombine.low %v440_v63, %v444_v3  ;;  %v491_v43 = vld [vmem:[#allocation8 + $0x960] sm:$0xff]  ;;  %v492_v45 = vld [vmem:[#allocation8 + $0x968] sm:$0xff] }
  0xfa   :  { %3340 = vmatprep.subr.bf16.mxu0 %v4258_v60  ;;  %3512 = vmatprep.subr.bf16.mxu1 %v4260_v1  ;;  %v4314_v60 = vcombine.high %v447_v54, %v451_v55  ;;  %v4316_v1 = vcombine.high %v448_v56, %v452_v57  ;;  %v495_v2 = vld [vmem:[#allocation8 + $0x980] sm:$0xff]  ;;  %v496_v63 = vld [vmem:[#allocation8 + $0x988] sm:$0xff] }
  0xfb   :  { %v499_v50 = vld [vmem:[#allocation8 + $0x9a0] sm:$0xff]  ;;  %v500_v3 = vld [vmem:[#allocation8 + $0x9a8] sm:$0xff] }
  0xfd   :  { %3341 = vmatpush1.bf16.msra.mxu0 %v4257_v9  ;;  %3513 = vmatpush1.bf16.msra.mxu1 %v4259_v10  ;;  %v4313_v9 = vcombine.low %v447_v54, %v451_v55  ;;  %v4315_v10 = vcombine.low %v448_v56, %v452_v57  ;;  %v503_v54 = vld [vmem:[#allocation8 + $0x9c0] sm:$0xff]  ;;  %v504_v56 = vld [vmem:[#allocation8 + $0x9c8] sm:$0xff] }
  0xfe   :  { %3342 = vmatprep.subr.bf16.mxu0 %v4266_v11  ;;  %3514 = vmatprep.subr.bf16.mxu1 %v4268_v12  ;;  %v4322_v11 = vcombine.high %v455_v4, %v459_v6  ;;  %v4324_v12 = vcombine.high %v456_v7, %v460_v8  ;;  %v507_v55 = vld [vmem:[#allocation8 + $0x9e0] sm:$0xff]  ;;  %v508_v57 = vld [vmem:[#allocation8 + $0x9e8] sm:$0xff] }
 0x101   :  { %3343 = vmatpush1.bf16.msra.mxu0 %v4265_v20  ;;  %3515 = vmatpush1.bf16.msra.mxu1 %v4267_v21  ;;  %v4321_v20 = vcombine.low %v455_v4, %v459_v6  ;;  %v4323_v21 = vcombine.low %v456_v7, %v460_v8  ;;  %v511_v4 = vld [vmem:[#allocation8 + $0xa00] sm:$0xff]  ;;  %v512_v7 = vld [vmem:[#allocation8 + $0xa08] sm:$0xff] }
 0x102   :  { %3344 = vmatprep.subr.bf16.mxu0 %v4274_v26  ;;  %3516 = vmatprep.subr.bf16.mxu1 %v4276_v22  ;;  %v4330_v26 = vcombine.high %v463_v13, %v467_v15  ;;  %v4332_v22 = vcombine.high %v464_v16, %v468_v19  ;;  %v515_v6 = vld [vmem:[#allocation8 + $0xa20] sm:$0xff]  ;;  %v516_v8 = vld [vmem:[#allocation8 + $0xa28] sm:$0xff] }
 0x105   :  { %3345 = vmatpush1.bf16.msra.mxu0 %v4273_v25  ;;  %3517 = vmatpush1.bf16.msra.mxu1 %v4275_v48  ;;  %v4329_v25 = vcombine.low %v463_v13, %v467_v15  ;;  %v4331_v48 = vcombine.low %v464_v16, %v468_v19  ;;  %v519_v13 = vld [vmem:[#allocation8 + $0xa40] sm:$0xff]  ;;  %v520_v16 = vld [vmem:[#allocation8 + $0xa48] sm:$0xff] }
 0x106   :  { %3346 = vmatprep.subr.bf16.mxu0 %v4282_v31  ;;  %3518 = vmatprep.subr.bf16.mxu1 %v4284_v32  ;;  %v4338_v31 = vcombine.high %v471_v23, %v475_v24  ;;  %v4340_v32 = vcombine.high %v472_v27, %v476_v49  ;;  %v523_v15 = vld [vmem:[#allocation8 + $0xa60] sm:$0xff]  ;;  %v524_v19 = vld [vmem:[#allocation8 + $0xa68] sm:$0xff] }
 0x109   :  { %3347 = vmatpush1.bf16.msra.mxu0 %v4281_v38  ;;  %3519 = vmatpush1.bf16.msra.mxu1 %v4283_v39  ;;  %v4337_v38 = vcombine.low %v471_v23, %v475_v24  ;;  %v4339_v39 = vcombine.low %v472_v27, %v476_v49  ;;  %v527_v23 = vld [vmem:[#allocation8 + $0xa80] sm:$0xff]  ;;  %v528_v27 = vld [vmem:[#allocation8 + $0xa88] sm:$0xff] }
 0x10a   :  { %3348 = vmatprep.subr.bf16.mxu0 %v4290_v40  ;;  %3520 = vmatprep.subr.bf16.mxu1 %v4292_v41  ;;  %v4346_v40 = vcombine.high %v479_v33, %v483_v34  ;;  %v4348_v41 = vcombine.high %v480_v36, %v484_v37  ;;  %v531_v24 = vld [vmem:[#allocation8 + $0xaa0] sm:$0xff]  ;;  %v532_v49 = vld [vmem:[#allocation8 + $0xaa8] sm:$0xff] }
 0x10d   :  { %3349 = vmatpush1.bf16.msra.mxu0 %v4289_v46  ;;  %3521 = vmatpush1.bf16.msra.mxu1 %v4291_v47  ;;  %v4345_v46 = vcombine.low %v479_v33, %v483_v34  ;;  %v4347_v47 = vcombine.low %v480_v36, %v484_v37  ;;  %v535_v33 = vld [vmem:[#allocation8 + $0xac0] sm:$0xff]  ;;  %v536_v36 = vld [vmem:[#allocation8 + $0xac8] sm:$0xff] }
 0x10e   :  { %3350 = vmatprep.subr.bf16.mxu0 %v4298_v61  ;;  %3522 = vmatprep.subr.bf16.mxu1 %v4300_v62  ;;  %v4354_v61 = vcombine.high %v487_v42, %v491_v43  ;;  %v4356_v62 = vcombine.high %v488_v44, %v492_v45  ;;  %v539_v34 = vld [vmem:[#allocation8 + $0xae0] sm:$0xff]  ;;  %v540_v37 = vld [vmem:[#allocation8 + $0xae8] sm:$0xff] }
 0x111   :  { %3351 = vmatpush1.bf16.msra.mxu0 %v4297_v5  ;;  %3523 = vmatpush1.bf16.msra.mxu1 %v4299_v51  ;;  %v4353_v5 = vcombine.low %v487_v42, %v491_v43  ;;  %v4355_v51 = vcombine.low %v488_v44, %v492_v45  ;;  %v543_v42 = vld [vmem:[#allocation8 + $0xb00] sm:$0xff]  ;;  %v544_v44 = vld [vmem:[#allocation8 + $0xb08] sm:$0xff] }
 0x112   :  { %3352 = vmatprep.subr.bf16.mxu0 %v4306_v52  ;;  %3524 = vmatprep.subr.bf16.mxu1 %v4308_v53  ;;  %v4362_v52 = vcombine.high %v495_v2, %v499_v50  ;;  %v4364_v53 = vcombine.high %v496_v63, %v500_v3  ;;  %v547_v43 = vld [vmem:[#allocation8 + $0xb20] sm:$0xff]  ;;  %v548_v45 = vld [vmem:[#allocation8 + $0xb28] sm:$0xff] }
 0x115   :  { %3353 = vmatpush1.bf16.msra.mxu0 %v4305_v58  ;;  %3525 = vmatpush1.bf16.msra.mxu1 %v4307_v59  ;;  %v4361_v58 = vcombine.low %v495_v2, %v499_v50  ;;  %v4363_v59 = vcombine.low %v496_v63, %v500_v3  ;;  %v551_v2 = vld [vmem:[#allocation8 + $0xb40] sm:$0xff]  ;;  %v552_v63 = vld [vmem:[#allocation8 + $0xb48] sm:$0xff] }
 0x116   :  { %3365 = vmatprep.subr.bf16.mxu0 %v4314_v60  ;;  %3537 = vmatprep.subr.bf16.mxu1 %v4316_v1  ;;  %v4370_v60 = vcombine.high %v503_v54, %v507_v55  ;;  %v4372_v1 = vcombine.high %v504_v56, %v508_v57  ;;  %v555_v50 = vld [vmem:[#allocation8 + $0xb60] sm:$0xff]  ;;  %v556_v3 = vld [vmem:[#allocation8 + $0xb68] sm:$0xff] }
 0x118   :  { %3355 = vmatmul.mubr.bf16.vlgmr.msra.gmra.mrb[0].mxu0 %v4944_v28  ;;  %3527 = vmatmul.mubr.bf16.vlgmr.msra.gmra.mrb[0].mxu1 %v4944_v28 }
 0x119   :  { %3366 = vmatpush1.bf16.msra.mxu0 %v4313_v9  ;;  %3397 = vmatprep.mubr.bf16.mxu0 %v4950_v35  ;;  %v4369_v9 = vcombine.low %v503_v54, %v507_v55  ;;  %v559_v54 = vld [vmem:[#allocation8 + $0xb80] sm:$0xff] }
 0x11a   :  { %3538 = vmatpush1.bf16.msra.mxu1 %v4315_v10  ;;  %3569 = vmatprep.mubr.bf16.mxu1 %v4950_v35  ;;  %v4371_v10 = vcombine.low %v504_v56, %v508_v57  ;;  %v563_v55 = vld [vmem:[#allocation8 + $0xba0] sm:$0xff]  ;;  %v560_v56 = vld [vmem:[#allocation8 + $0xb88] sm:$0xff] }
 0x11b   :  { %3367 = vmatprep.subr.bf16.mxu0 %v4322_v11  ;;  %3539 = vmatprep.subr.bf16.mxu1 %v4324_v12  ;;  %v4378_v11 = vcombine.high %v511_v4, %v515_v6  ;;  %v4380_v12 = vcombine.high %v512_v7, %v516_v8  ;;  %v564_v57 = vld [vmem:[#allocation8 + $0xba8] sm:$0xff] }
 0x11d   :  { %3368 = vmatpush1.bf16.msra.mxu0 %v4321_v20  ;;  %v4377_v20 = vcombine.low %v511_v4, %v515_v6  ;;  %v567_v4 = vld [vmem:[#allocation8 + $0xbc0] sm:$0xff] }
 0x11e   :  { %3540 = vmatpush1.bf16.msra.mxu1 %v4323_v21  ;;  %3369 = vmatprep.subr.bf16.mxu0 %v4330_v26  ;;  %v4379_v21 = vcombine.low %v512_v7, %v516_v8  ;;  %v4386_v26 = vcombine.high %v519_v13, %v523_v15  ;;  %v571_v6 = vld [vmem:[#allocation8 + $0xbe0] sm:$0xff]  ;;  %v568_v7 = vld [vmem:[#allocation8 + $0xbc8] sm:$0xff] }
 0x11f   :  { %3541 = vmatprep.subr.bf16.mxu1 %v4332_v22  ;;  %v4388_v22 = vcombine.high %v520_v16, %v524_v19  ;;  %v572_v8 = vld [vmem:[#allocation8 + $0xbe8] sm:$0xff] }
 0x121   :  { %3370 = vmatpush1.bf16.msra.mxu0 %v4329_v25  ;;  %v4385_v25 = vcombine.low %v519_v13, %v523_v15  ;;  %v575_v13 = vld [vmem:[#allocation8 + $0xc00] sm:$0xff] }
 0x122   :  { %3542 = vmatpush1.bf16.msra.mxu1 %v4331_v48  ;;  %3371 = vmatprep.subr.bf16.mxu0 %v4338_v31  ;;  %v4387_v48 = vcombine.low %v520_v16, %v524_v19  ;;  %v4394_v31 = vcombine.high %v527_v23, %v531_v24  ;;  %v579_v15 = vld [vmem:[#allocation8 + $0xc20] sm:$0xff]  ;;  %v576_v16 = vld [vmem:[#allocation8 + $0xc08] sm:$0xff] }
 0x123   :  { %3543 = vmatprep.subr.bf16.mxu1 %v4340_v32  ;;  %v4396_v32 = vcombine.high %v528_v27, %v532_v49  ;;  %v580_v19 = vld [vmem:[#allocation8 + $0xc28] sm:$0xff] }
 0x125   :  { %3372 = vmatpush1.bf16.msra.mxu0 %v4337_v38  ;;  %v4393_v38 = vcombine.low %v527_v23, %v531_v24  ;;  %v583_v23 = vld [vmem:[#allocation8 + $0xc40] sm:$0xff] }
 0x126   :  { %3544 = vmatpush1.bf16.msra.mxu1 %v4339_v39  ;;  %3373 = vmatprep.subr.bf16.mxu0 %v4346_v40  ;;  %v4395_v39 = vcombine.low %v528_v27, %v532_v49  ;;  %v4402_v40 = vcombine.high %v535_v33, %v539_v34  ;;  %v587_v24 = vld [vmem:[#allocation8 + $0xc60] sm:$0xff]  ;;  %v4441_v27 = vcombine.low %v575_v13, %v579_v15  ;;  %v584_v49 = vld [vmem:[#allocation8 + $0xc48] sm:$0xff] }
 0x127   :  { %3545 = vmatprep.subr.bf16.mxu1 %v4348_v41  ;;  %v4404_v41 = vcombine.high %v536_v36, %v540_v37 }
 0x129   :  { %3374 = vmatpush1.bf16.msra.mxu0 %v4345_v46  ;;  %v4401_v46 = vcombine.low %v535_v33, %v539_v34  ;;  %v595_v33 = vld [vmem:[#allocation8 + $0xca0] sm:$0xff] }
 0x12a   :  { %3546 = vmatpush1.bf16.msra.mxu1 %v4347_v47  ;;  %3375 = vmatprep.subr.bf16.mxu0 %v4354_v61  ;;  %v4403_v47 = vcombine.low %v536_v36, %v540_v37  ;;  %v4410_v61 = vcombine.high %v543_v42, %v547_v43  ;;  %v592_v36 = vld [vmem:[#allocation8 + $0xc88] sm:$0xff] }
 0x12b   :  { %3547 = vmatprep.subr.bf16.mxu1 %v4356_v62  ;;  %v4412_v62 = vcombine.high %v544_v44, %v548_v45  ;;  %v596_v37 = vld [vmem:[#allocation8 + $0xca8] sm:$0xff] }
 0x12d   :  { %3376 = vmatpush1.bf16.msra.mxu0 %v4353_v5  ;;  %v4409_v5 = vcombine.low %v543_v42, %v547_v43  ;;  %v599_v42 = vld [vmem:[#allocation8 + $0xcc0] sm:$0xff] }
 0x12e   :  { %3548 = vmatpush1.bf16.msra.mxu1 %v4355_v51  ;;  %3377 = vmatprep.subr.bf16.mxu0 %v4362_v52  ;;  %v4411_v51 = vcombine.low %v544_v44, %v548_v45  ;;  %v4418_v52 = vcombine.high %v551_v2, %v555_v50  ;;  %v603_v43 = vld [vmem:[#allocation8 + $0xce0] sm:$0xff]  ;;  %v600_v44 = vld [vmem:[#allocation8 + $0xcc8] sm:$0xff] }
 0x12f   :  { %3549 = vmatprep.subr.bf16.mxu1 %v4364_v53  ;;  %v4420_v53 = vcombine.high %v552_v63, %v556_v3  ;;  %v604_v45 = vld [vmem:[#allocation8 + $0xce8] sm:$0xff] }
 0x131   :  { %3378 = vmatpush1.bf16.msra.mxu0 %v4361_v58  ;;  %v4417_v58 = vcombine.low %v551_v2, %v555_v50  ;;  %v607_v2 = vld [vmem:[#allocation8 + $0xd00] sm:$0xff] }
 0x132   :  { %3550 = vmatpush1.bf16.msra.mxu1 %v4363_v59  ;;  %3379 = vmatprep.subr.bf16.mxu0 %v4370_v60  ;;  %v4419_v59 = vcombine.low %v552_v63, %v556_v3  ;;  %v4426_v60 = vcombine.high %v559_v54, %v563_v55  ;;  %v611_v50 = vld [vmem:[#allocation8 + $0xd20] sm:$0xff]  ;;  %v608_v63 = vld [vmem:[#allocation8 + $0xd08] sm:$0xff] }
 0x133   :  { %3551 = vmatprep.subr.bf16.mxu1 %v4372_v1  ;;  %v4428_v1 = vcombine.high %v560_v56, %v564_v57  ;;  %v612_v3 = vld [vmem:[#allocation8 + $0xd28] sm:$0xff] }
 0x135   :  { %3380 = vmatpush1.bf16.msra.mxu0 %v4369_v9  ;;  %v4425_v9 = vcombine.low %v559_v54, %v563_v55  ;;  %v615_v54 = vld [vmem:[#allocation8 + $0xd40] sm:$0xff] }
 0x136   :  { %3552 = vmatpush1.bf16.msra.mxu1 %v4371_v10  ;;  %3381 = vmatprep.subr.bf16.mxu0 %v4378_v11  ;;  %v4427_v10 = vcombine.low %v560_v56, %v564_v57  ;;  %v4434_v11 = vcombine.high %v567_v4, %v571_v6  ;;  %v619_v55 = vld [vmem:[#allocation8 + $0xd60] sm:$0xff]  ;;  %v616_v56 = vld [vmem:[#allocation8 + $0xd48] sm:$0xff] }
 0x137   :  { %3553 = vmatprep.subr.bf16.mxu1 %v4380_v12  ;;  %v4436_v12 = vcombine.high %v568_v7, %v572_v8  ;;  %v620_v57 = vld [vmem:[#allocation8 + $0xd68] sm:$0xff] }
 0x139   :  { %3382 = vmatpush1.bf16.msra.mxu0 %v4377_v20  ;;  %v4433_v20 = vcombine.low %v567_v4, %v571_v6  ;;  %v623_v4 = vld [vmem:[#allocation8 + $0xd80] sm:$0xff] }
 0x13a   :  { %3554 = vmatpush1.bf16.msra.mxu1 %v4379_v21  ;;  %3383 = vmatprep.subr.bf16.mxu0 %v4386_v26  ;;  %v4435_v21 = vcombine.low %v568_v7, %v572_v8  ;;  %v4442_v26 = vcombine.high %v575_v13, %v579_v15  ;;  %v627_v6 = vld [vmem:[#allocation8 + $0xda0] sm:$0xff]  ;;  %v624_v7 = vld [vmem:[#allocation8 + $0xd88] sm:$0xff] }
 0x13b   :  { %3555 = vmatprep.subr.bf16.mxu1 %v4388_v22  ;;  %v4444_v22 = vcombine.high %v576_v16, %v580_v19  ;;  %v628_v8 = vld [vmem:[#allocation8 + $0xda8] sm:$0xff]  ;;  %v631_v13 = vld [vmem:[#allocation8 + $0xdc0] sm:$0xff] }
 0x13c   :  { %v635_v15 = vld [vmem:[#allocation8 + $0xde0] sm:$0xff] }
 0x13d   :  { %3384 = vmatpush1.bf16.msra.mxu0 %v4385_v25  ;;  %v588_v25 = vld [vmem:[#allocation8 + $0xc68] sm:$0xff] }
 0x13e   :  { %3556 = vmatpush1.bf16.msra.mxu1 %v4387_v48  ;;  %3385 = vmatprep.subr.bf16.mxu0 %v4394_v31  ;;  %v4443_v48 = vcombine.low %v576_v16, %v580_v19  ;;  %v4450_v31 = vcombine.high %v583_v23, %v587_v24  ;;  %v4452_v34 = vcombine.high %v584_v49, %v588_v25  ;;  %v632_v16 = vld [vmem:[#allocation8 + $0xdc8] sm:$0xff] }
 0x13f   :  { %3557 = vmatprep.subr.bf16.mxu1 %v4396_v32  ;;  %v591_v32 = vld [vmem:[#allocation8 + $0xc80] sm:$0xff]  ;;  %v636_v19 = vld [vmem:[#allocation8 + $0xde8] sm:$0xff] }
 0x141   :  { %3386 = vmatpush1.bf16.msra.mxu0 %v4393_v38  ;;  %v4449_v38 = vcombine.low %v583_v23, %v587_v24  ;;  %v639_v23 = vld [vmem:[#allocation8 + $0xe00] sm:$0xff] }
 0x142   :  { %3558 = vmatpush1.bf16.msra.mxu1 %v4395_v39  ;;  %3387 = vmatprep.subr.bf16.mxu0 %v4402_v40  ;;  %v4451_v39 = vcombine.low %v584_v49, %v588_v25  ;;  %v4458_v40 = vcombine.high %v591_v32, %v595_v33  ;;  %v643_v24 = vld [vmem:[#allocation8 + $0xe20] sm:$0xff]  ;;  %v644_v49 = vld [vmem:[#allocation8 + $0xe28] sm:$0xff]  ;;  %v4497_v25 = vcombine.low %v631_v13, %v635_v15 }
 0x143   :  { %3559 = vmatprep.subr.bf16.mxu1 %v4404_v41  ;;  %v4460_v41 = vcombine.high %v592_v36, %v596_v37 }
 0x145   :  { %3388 = vmatpush1.bf16.msra.mxu0 %v4401_v46  ;;  %v4457_v46 = vcombine.low %v591_v32, %v595_v33  ;;  %v647_v33 = vld [vmem:[#allocation8 + $0xe40] sm:$0xff] }
 0x146   :  { %3560 = vmatpush1.bf16.msra.mxu1 %v4403_v47  ;;  %3389 = vmatprep.subr.bf16.mxu0 %v4410_v61  ;;  %v4459_v47 = vcombine.low %v592_v36, %v596_v37  ;;  %v4466_v61 = vcombine.high %v599_v42, %v603_v43  ;;  %v648_v36 = vld [vmem:[#allocation8 + $0xe48] sm:$0xff] }
 0x147   :  { %3561 = vmatprep.subr.bf16.mxu1 %v4412_v62  ;;  %v4468_v62 = vcombine.high %v600_v44, %v604_v45  ;;  %v652_v37 = vld [vmem:[#allocation8 + $0xe68] sm:$0xff] }
 0x149   :  { %3390 = vmatpush1.bf16.msra.mxu0 %v4409_v5  ;;  %v4465_v5 = vcombine.low %v599_v42, %v603_v43  ;;  %v655_v42 = vld [vmem:[#allocation8 + $0xe80] sm:$0xff] }
 0x14a   :  { %3562 = vmatpush1.bf16.msra.mxu1 %v4411_v51  ;;  %3391 = vmatprep.subr.bf16.mxu0 %v4418_v52  ;;  %v4467_v51 = vcombine.low %v600_v44, %v604_v45  ;;  %v4474_v52 = vcombine.high %v607_v2, %v611_v50  ;;  %v659_v43 = vld [vmem:[#allocation8 + $0xea0] sm:$0xff]  ;;  %v656_v44 = vld [vmem:[#allocation8 + $0xe88] sm:$0xff] }
 0x14b   :  { %3563 = vmatprep.subr.bf16.mxu1 %v4420_v53  ;;  %v4476_v53 = vcombine.high %v608_v63, %v612_v3  ;;  %v660_v45 = vld [vmem:[#allocation8 + $0xea8] sm:$0xff] }
 0x14d   :  { %3392 = vmatpush1.bf16.msra.mxu0 %v4417_v58  ;;  %v4473_v58 = vcombine.low %v607_v2, %v611_v50  ;;  %v663_v2 = vld [vmem:[#allocation8 + $0xec0] sm:$0xff] }
 0x14e   :  { %3564 = vmatpush1.bf16.msra.mxu1 %v4419_v59  ;;  %3393 = vmatprep.subr.bf16.mxu0 %v4426_v60  ;;  %v4475_v59 = vcombine.low %v608_v63, %v612_v3  ;;  %v4482_v60 = vcombine.high %v615_v54, %v619_v55  ;;  %v667_v50 = vld [vmem:[#allocation8 + $0xee0] sm:$0xff]  ;;  %v664_v63 = vld [vmem:[#allocation8 + $0xec8] sm:$0xff] }
 0x14f   :  { %3565 = vmatprep.subr.bf16.mxu1 %v4428_v1  ;;  %v4484_v1 = vcombine.high %v616_v56, %v620_v57  ;;  %v668_v3 = vld [vmem:[#allocation8 + $0xee8] sm:$0xff] }
 0x151   :  { %3394 = vmatpush1.bf16.msra.mxu0 %v4425_v9  ;;  %v4481_v9 = vcombine.low %v615_v54, %v619_v55  ;;  %v671_v54 = vld [vmem:[#allocation8 + $0xf00] sm:$0xff] }
 0x152   :  { %3566 = vmatpush1.bf16.msra.mxu1 %v4427_v10  ;;  %3395 = vmatprep.subr.bf16.mxu0 %v4434_v11  ;;  %v4483_v10 = vcombine.low %v616_v56, %v620_v57  ;;  %v4490_v11 = vcombine.high %v623_v4, %v627_v6  ;;  %v675_v55 = vld [vmem:[#allocation8 + $0xf20] sm:$0xff]  ;;  %v672_v56 = vld [vmem:[#allocation8 + $0xf08] sm:$0xff] }
 0x153   :  { %3567 = vmatprep.subr.bf16.mxu1 %v4436_v12  ;;  %v4492_v12 = vcombine.high %v624_v7, %v628_v8  ;;  %v676_v57 = vld [vmem:[#allocation8 + $0xf28] sm:$0xff] }
 0x155   :  { %3396 = vmatpush1.bf16.msra.mxu0 %v4433_v20  ;;  %v4489_v20 = vcombine.low %v623_v4, %v627_v6  ;;  %v679_v4 = vld [vmem:[#allocation8 + $0xf40] sm:$0xff] }
 0x156   :  { %3568 = vmatpush1.bf16.msra.mxu1 %v4435_v21  ;;  %3408 = vmatprep.subr.bf16.mxu0 %v4442_v26  ;;  %v4491_v21 = vcombine.low %v624_v7, %v628_v8  ;;  %v4498_v26 = vcombine.high %v631_v13, %v635_v15  ;;  %v683_v6 = vld [vmem:[#allocation8 + $0xf60] sm:$0xff]  ;;  %v680_v7 = vld [vmem:[#allocation8 + $0xf48] sm:$0xff] }
 0x157   :  { %3580 = vmatprep.subr.bf16.mxu1 %v4444_v22  ;;  %v4500_v22 = vcombine.high %v632_v16, %v636_v19  ;;  %v684_v8 = vld [vmem:[#allocation8 + $0xf68] sm:$0xff]  ;;  %v687_v13 = vld [vmem:[#allocation8 + $0xf80] sm:$0xff] }
 0x158   :  { %3398 = vmatmul.mubr.bf16.vlgmr.msra.gmra.mrb[0].mxu0 %v4973_v0  ;;  %v691_v15 = vld [vmem:[#allocation8 + $0xfa0] sm:$0xff] }
 0x159   :  { %3570 = vmatmul.mubr.bf16.vlgmr.msra.gmra.mrb[0].mxu1 %v4973_v0  ;;  %3409 = vmatpush1.bf16.msra.mxu0 %v4441_v27  ;;  %v640_v27 = vld [vmem:[#allocation8 + $0xe08] sm:$0xff] }
 0x15a   :  { %3440 = vmatprep.mubr.bf16.mxu0 %v4978_v14  ;;  %3581 = vmatpush1.bf16.msra.mxu1 %v4443_v48  ;;  %v4499_v48 = vcombine.low %v632_v16, %v636_v19  ;;  %v4508_v32 = vcombine.high %v640_v27, %v644_v49  ;;  %v688_v16 = vld [vmem:[#allocation8 + $0xf88] sm:$0xff] }
 0x15b   :  { %3612 = vmatprep.mubr.bf16.mxu1 %v4978_v14  ;;  %3410 = vmatprep.subr.bf16.mxu0 %v4450_v31  ;;  %v4506_v31 = vcombine.high %v639_v23, %v643_v24  ;;  %v692_v19 = vld [vmem:[#allocation8 + $0xfa8] sm:$0xff] }
 0x15c   :  { %3582 = vmatprep.subr.bf16.mxu1 %v4452_v34  ;;  %v651_v34 = vld [vmem:[#allocation8 + $0xe60] sm:$0xff] }
 0x15d   :  { %3411 = vmatpush1.bf16.msra.mxu0 %v4449_v38  ;;  %v4505_v38 = vcombine.low %v639_v23, %v643_v24  ;;  %v695_v23 = vld [vmem:[#allocation8 + $0xfc0] sm:$0xff] }
 0x15e   :  { %3583 = vmatpush1.bf16.msra.mxu1 %v4451_v39  ;;  %3412 = vmatprep.subr.bf16.mxu0 %v4458_v40  ;;  %v4507_v39 = vcombine.low %v640_v27, %v644_v49  ;;  %v4514_v40 = vcombine.high %v647_v33, %v651_v34  ;;  %v699_v24 = vld [vmem:[#allocation8 + $0xfe0] sm:$0xff]  ;;  %v696_v27 = vld [vmem:[#allocation8 + $0xfc8] sm:$0xff] }
 0x15f   :  { %3584 = vmatprep.subr.bf16.mxu1 %v4460_v41  ;;  %v4516_v41 = vcombine.high %v648_v36, %v652_v37  ;;  %v700_v49 = vld [vmem:[#allocation8 + $0xfe8] sm:$0xff] }
 0x161   :  { %3413 = vmatpush1.bf16.msra.mxu0 %v4457_v46  ;;  %v4513_v46 = vcombine.low %v647_v33, %v651_v34  ;;  %v193_v33 = vld [vmem:[#allocation8 + $0x10] sm:$0xff] }
 0x162   :  { %3585 = vmatpush1.bf16.msra.mxu1 %v4459_v47  ;;  %3414 = vmatprep.subr.bf16.mxu0 %v4466_v61  ;;  %v4515_v47 = vcombine.low %v648_v36, %v652_v37  ;;  %v4522_v61 = vcombine.high %v655_v42, %v659_v43  ;;  %v197_v34 = vld [vmem:[#allocation8 + $0x30] sm:$0xff]  ;;  %v194_v36 = vld [vmem:[#allocation8 + $0x18] sm:$0xff] }
 0x163   :  { %3586 = vmatprep.subr.bf16.mxu1 %v4468_v62  ;;  %v4524_v62 = vcombine.high %v656_v44, %v660_v45  ;;  %v198_v37 = vld [vmem:[#allocation8 + $0x38] sm:$0xff] }
 0x165   :  { %3415 = vmatpush1.bf16.msra.mxu0 %v4465_v5  ;;  %v4521_v5 = vcombine.low %v655_v42, %v659_v43  ;;  %v201_v42 = vld [vmem:[#allocation8 + $0x50] sm:$0xff] }
 0x166   :  { %3587 = vmatpush1.bf16.msra.mxu1 %v4467_v51  ;;  %3416 = vmatprep.subr.bf16.mxu0 %v4474_v52  ;;  %v4523_v51 = vcombine.low %v656_v44, %v660_v45  ;;  %v4530_v52 = vcombine.high %v663_v2, %v667_v50  ;;  %v205_v43 = vld [vmem:[#allocation8 + $0x70] sm:$0xff]  ;;  %v4061_v44 = vcombine.low %v193_v33, %v197_v34  ;;  %v202_v45 = vld [vmem:[#allocation8 + $0x58] sm:$0xff] }
 0x167   :  { %3588 = vmatprep.subr.bf16.mxu1 %v4476_v53  ;;  %v4532_v53 = vcombine.high %v664_v63, %v668_v3 }
 0x169   :  { %3417 = vmatpush1.bf16.msra.mxu0 %v4473_v58  ;;  %v4529_v58 = vcombine.low %v663_v2, %v667_v50  ;;  %v213_v2 = vld [vmem:[#allocation8 + $0xb0] sm:$0xff] }
 0x16a   :  { %3589 = vmatpush1.bf16.msra.mxu1 %v4475_v59  ;;  %3418 = vmatprep.subr.bf16.mxu0 %v4482_v60  ;;  %v4531_v59 = vcombine.low %v664_v63, %v668_v3  ;;  %v4538_v60 = vcombine.high %v671_v54, %v675_v55  ;;  %v210_v63 = vld [vmem:[#allocation8 + $0x98] sm:$0xff] }
 0x16b   :  { %3590 = vmatprep.subr.bf16.mxu1 %v4484_v1  ;;  %v4540_v1 = vcombine.high %v672_v56, %v676_v57  ;;  %v214_v3 = vld [vmem:[#allocation8 + $0xb8] sm:$0xff] }
 0x16d   :  { %3419 = vmatpush1.bf16.msra.mxu0 %v4481_v9  ;;  %v4537_v9 = vcombine.low %v671_v54, %v675_v55  ;;  %v217_v54 = vld [vmem:[#allocation8 + $0xd0] sm:$0xff] }
 0x16e   :  { %3591 = vmatpush1.bf16.msra.mxu1 %v4483_v10  ;;  %3420 = vmatprep.subr.bf16.mxu0 %v4490_v11  ;;  %v4539_v10 = vcombine.low %v672_v56, %v676_v57  ;;  %v4546_v11 = vcombine.high %v679_v4, %v683_v6  ;;  %v221_v55 = vld [vmem:[#allocation8 + $0xf0] sm:$0xff]  ;;  %v218_v56 = vld [vmem:[#allocation8 + $0xd8] sm:$0xff] }
 0x16f   :  { %3592 = vmatprep.subr.bf16.mxu1 %v4492_v12  ;;  %v4548_v12 = vcombine.high %v680_v7, %v684_v8  ;;  %v222_v57 = vld [vmem:[#allocation8 + $0xf8] sm:$0xff] }
 0x171   :  { %3421 = vmatpush1.bf16.msra.mxu0 %v4489_v20  ;;  %v4545_v20 = vcombine.low %v679_v4, %v683_v6  ;;  %v225_v4 = vld [vmem:[#allocation8 + $0x110] sm:$0xff] }
 0x172   :  { %3593 = vmatpush1.bf16.msra.mxu1 %v4491_v21  ;;  %3422 = vmatprep.subr.bf16.mxu0 %v4498_v26  ;;  %v4547_v21 = vcombine.low %v680_v7, %v684_v8  ;;  %v4554_v26 = vcombine.high %v687_v13, %v691_v15  ;;  %v229_v6 = vld [vmem:[#allocation8 + $0x130] sm:$0xff]  ;;  %v226_v7 = vld [vmem:[#allocation8 + $0x118] sm:$0xff] }
 0x173   :  { %3594 = vmatprep.subr.bf16.mxu1 %v4500_v22  ;;  %v4556_v22 = vcombine.high %v688_v16, %v692_v19  ;;  %v230_v8 = vld [vmem:[#allocation8 + $0x138] sm:$0xff] }
 0x175   :  { %3423 = vmatpush1.bf16.msra.mxu0 %v4497_v25  ;;  %v4553_v25 = vcombine.low %v687_v13, %v691_v15  ;;  %v237_v13 = vld [vmem:[#allocation8 + $0x170] sm:$0xff]  ;;  %v234_v15 = vld [vmem:[#allocation8 + $0x158] sm:$0xff] }
 0x176   :  { %3595 = vmatpush1.bf16.msra.mxu1 %v4499_v48  ;;  %3424 = vmatprep.subr.bf16.mxu0 %v4506_v31  ;;  %v4555_v48 = vcombine.low %v688_v16, %v692_v19  ;;  %v4562_v31 = vcombine.high %v695_v23, %v699_v24  ;;  %v238_v16 = vld [vmem:[#allocation8 + $0x178] sm:$0xff]  ;;  %v4093_v19 = vcombine.low %v225_v4, %v229_v6 }
 0x177   :  { %3596 = vmatprep.subr.bf16.mxu1 %v4508_v32  ;;  %v4564_v32 = vcombine.high %v696_v27, %v700_v49 }
 0x179   :  { %3425 = vmatpush1.bf16.msra.mxu0 %v4505_v38  ;;  %v4561_v38 = vcombine.low %v695_v23, %v699_v24  ;;  %v245_v23 = vld [vmem:[#allocation8 + $0x1b0] sm:$0xff]  ;;  %v242_v24 = vld [vmem:[#allocation8 + $0x198] sm:$0xff] }
 0x17a   :  { %3597 = vmatpush1.bf16.msra.mxu1 %v4507_v39  ;;  %3426 = vmatprep.subr.bf16.mxu0 %v4514_v40  ;;  %v4563_v39 = vcombine.low %v696_v27, %v700_v49  ;;  %v4062_v40 = vcombine.high %v193_v33, %v197_v34  ;;  %v246_v27 = vld [vmem:[#allocation8 + $0x1b8] sm:$0xff]  ;;  %v253_v33 = vld [vmem:[#allocation8 + $0x1f0] sm:$0xff] }
 0x17b   :  { %3598 = vmatprep.subr.bf16.mxu1 %v4516_v41  ;;  %v4064_v41 = vcombine.high %v194_v36, %v198_v37  ;;  %v250_v34 = vld [vmem:[#allocation8 + $0x1d8] sm:$0xff] }
 0x17d   :  { %3427 = vmatpush1.bf16.msra.mxu0 %v4513_v46  ;;  %v206_v46 = vld [vmem:[#allocation8 + $0x78] sm:$0xff] }
 0x17e   :  { %3599 = vmatpush1.bf16.msra.mxu1 %v4515_v47  ;;  %3428 = vmatprep.subr.bf16.mxu0 %v4522_v61  ;;  %v4063_v47 = vcombine.low %v194_v36, %v198_v37  ;;  %v4070_v61 = vcombine.high %v201_v42, %v205_v43  ;;  %v4072_v50 = vcombine.high %v202_v45, %v206_v46  ;;  %v254_v36 = vld [vmem:[#allocation8 + $0x1f8] sm:$0xff] }
 0x17f   :  { %3600 = vmatprep.subr.bf16.mxu1 %v4524_v62  ;;  %v209_v62 = vld [vmem:[#allocation8 + $0x90] sm:$0xff] }
 0x181   :  { %3429 = vmatpush1.bf16.msra.mxu0 %v4521_v5  ;;  %v4069_v5 = vcombine.low %v201_v42, %v205_v43  ;;  %v261_v42 = vld [vmem:[#allocation8 + $0x230] sm:$0xff]  ;;  %v258_v43 = vld [vmem:[#allocation8 + $0x218] sm:$0xff] }
 0x182   :  { %3601 = vmatpush1.bf16.msra.mxu1 %v4523_v51  ;;  %3430 = vmatprep.subr.bf16.mxu0 %v4530_v52  ;;  %v4071_v51 = vcombine.low %v202_v45, %v206_v46  ;;  %v4078_v52 = vcombine.high %v209_v62, %v213_v2  ;;  %v4119_v46 = vcombine.low %v250_v34, %v254_v36 }
 0x183   :  { %3602 = vmatprep.subr.bf16.mxu1 %v4532_v53  ;;  %v4080_v53 = vcombine.high %v210_v63, %v214_v3 }
 0x185   :  { %3431 = vmatpush1.bf16.msra.mxu0 %v4529_v58  ;;  %v4077_v58 = vcombine.low %v209_v62, %v213_v2  ;;  %v265_v62 = vld [vmem:[#allocation8 + $0x250] sm:$0xff] }
 0x186   :  { %3603 = vmatpush1.bf16.msra.mxu1 %v4531_v59  ;;  %3432 = vmatprep.subr.bf16.mxu0 %v4538_v60  ;;  %v4079_v59 = vcombine.low %v210_v63, %v214_v3  ;;  %v4086_v60 = vcombine.high %v217_v54, %v221_v55  ;;  %v269_v2 = vld [vmem:[#allocation8 + $0x270] sm:$0xff]  ;;  %v270_v63 = vld [vmem:[#allocation8 + $0x278] sm:$0xff] }
 0x187   :  { %3604 = vmatprep.subr.bf16.mxu1 %v4540_v1  ;;  %v4088_v1 = vcombine.high %v218_v56, %v222_v57 }
 0x189   :  { %3433 = vmatpush1.bf16.msra.mxu0 %v4537_v9  ;;  %v4087_v9 = vcombine.low %v218_v56, %v222_v57  ;;  %v278_v56 = vld [vmem:[#allocation8 + $0x2b8] sm:$0xff]  ;;  %v4133_v57 = vcombine.low %v265_v62, %v269_v2 }
 0x18a   :  { %3605 = vmatpush1.bf16.msra.mxu1 %v4539_v10  ;;  %3434 = vmatprep.subr.bf16.mxu0 %v4546_v11  ;;  %v4094_v10 = vcombine.high %v225_v4, %v229_v6  ;;  %v4096_v11 = vcombine.high %v226_v7, %v230_v8  ;;  %v285_v4 = vld [vmem:[#allocation8 + $0x2f0] sm:$0xff]  ;;  %v282_v6 = vld [vmem:[#allocation8 + $0x2d8] sm:$0xff] }
 0x18b   :  { %3606 = vmatprep.subr.bf16.mxu1 %v4548_v12  ;;  %v233_v12 = vld [vmem:[#allocation8 + $0x150] sm:$0xff] }
 0x18c   :  { %v4101_v49 = vcombine.low %v233_v12, %v237_v13 }
 0x18d   :  { %3435 = vmatpush1.bf16.msra.mxu0 %v4545_v20  ;;  %v4095_v20 = vcombine.low %v226_v7, %v230_v8  ;;  %v286_v7 = vld [vmem:[#allocation8 + $0x2f8] sm:$0xff] }
 0x18e   :  { %3607 = vmatpush1.bf16.msra.mxu1 %v4547_v21  ;;  %3436 = vmatprep.subr.bf16.mxu0 %v4554_v26  ;;  %v4102_v21 = vcombine.high %v233_v12, %v237_v13  ;;  %v4104_v26 = vcombine.high %v234_v15, %v238_v16  ;;  %v293_v12 = vld [vmem:[#allocation8 + $0x330] sm:$0xff]  ;;  %v290_v13 = vld [vmem:[#allocation8 + $0x318] sm:$0xff] }
 0x18f   :  { %3608 = vmatprep.subr.bf16.mxu1 %v4556_v22  ;;  %v241_v22 = vld [vmem:[#allocation8 + $0x190] sm:$0xff] }
 0x190   :  { %v4109_v37 = vcombine.low %v241_v22, %v245_v23 }
 0x191   :  { %3437 = vmatpush1.bf16.msra.mxu0 %v4553_v25  ;;  %v4103_v25 = vcombine.low %v234_v15, %v238_v16  ;;  %v294_v15 = vld [vmem:[#allocation8 + $0x338] sm:$0xff] }
 0x192   :  { %3609 = vmatpush1.bf16.msra.mxu1 %v4555_v48  ;;  %3438 = vmatprep.subr.bf16.mxu0 %v4562_v31  ;;  %v4110_v48 = vcombine.high %v241_v22, %v245_v23  ;;  %v4112_v31 = vcombine.high %v242_v24, %v246_v27  ;;  %v301_v22 = vld [vmem:[#allocation8 + $0x370] sm:$0xff]  ;;  %v298_v23 = vld [vmem:[#allocation8 + $0x358] sm:$0xff] }
 0x193   :  { %3610 = vmatprep.subr.bf16.mxu1 %v4564_v32  ;;  %v249_v32 = vld [vmem:[#allocation8 + $0x1d0] sm:$0xff] }
 0x194   :  { %v4117_v45 = vcombine.low %v249_v32, %v253_v33 }
 0x195   :  { %3439 = vmatpush1.bf16.msra.mxu0 %v4561_v38  ;;  %v4111_v38 = vcombine.low %v242_v24, %v246_v27  ;;  %v302_v24 = vld [vmem:[#allocation8 + $0x378] sm:$0xff] }
 0x196   :  { %3611 = vmatpush1.bf16.msra.mxu1 %v4563_v39  ;;  %3623 = vmatprep.subr.bf16.mxu0 %v4062_v40  ;;  %v4118_v39 = vcombine.high %v249_v32, %v253_v33  ;;  %v4120_v40 = vcombine.high %v250_v34, %v254_v36  ;;  %v309_v32 = vld [vmem:[#allocation8 + $0x3b0] sm:$0xff]  ;;  %v306_v33 = vld [vmem:[#allocation8 + $0x398] sm:$0xff] }
 0x197   :  { %3795 = vmatprep.subr.bf16.mxu1 %v4064_v41  ;;  %v257_v41 = vld [vmem:[#allocation8 + $0x210] sm:$0xff]  ;;  %v310_v34 = vld [vmem:[#allocation8 + $0x3b8] sm:$0xff] }
 0x198   :  { %3441 = vmatmul.mubr.bf16.vlgmr.msra.gmra.mrb[0].mxu0 %v4981_v29  ;;  %v4125_v3 = vcombine.low %v257_v41, %v261_v42 }
 0x199   :  { %3613 = vmatmul.mubr.bf16.vlgmr.msra.gmra.mrb[0].mxu1 %v4981_v29  ;;  %3624 = vmatpush1.bf16.msra.mxu0 %v4061_v44  ;;  %v262_v44 = vld [vmem:[#allocation8 + $0x238] sm:$0xff] }
 0x19a   :  { %3655 = vmatprep.mubr.bf16.mxu0 %v4937_v17  ;;  %3796 = vmatpush1.bf16.msra.mxu1 %v4063_v47  ;;  %v4126_v47 = vcombine.high %v257_v41, %v261_v42  ;;  %v317_v41 = vld [vmem:[#allocation8 + $0x3f0] sm:$0xff]  ;;  %v314_v42 = vld [vmem:[#allocation8 + $0x3d8] sm:$0xff] }
 0x19b   :  { %3827 = vmatprep.mubr.bf16.mxu1 %v4937_v17  ;;  %3625 = vmatprep.subr.bf16.mxu0 %v4070_v61  ;;  %v4085_v17 = vcombine.low %v217_v54, %v221_v55  ;;  %v4128_v61 = vcombine.high %v258_v43, %v262_v44  ;;  %v277_v54 = vld [vmem:[#allocation8 + $0x2b0] sm:$0xff]  ;;  %v274_v55 = vld [vmem:[#allocation8 + $0x298] sm:$0xff] }
 0x19c   :  { %3797 = vmatprep.subr.bf16.mxu1 %v4072_v50  ;;  %v266_v50 = vld [vmem:[#allocation8 + $0x258] sm:$0xff] }
 0x19d   :  { %3626 = vmatpush1.bf16.msra.mxu0 %v4069_v5  ;;  %v4127_v5 = vcombine.low %v258_v43, %v262_v44  ;;  %v318_v43 = vld [vmem:[#allocation8 + $0x3f8] sm:$0xff] }
 0x19e   :  { %3798 = vmatpush1.bf16.msra.mxu1 %v4071_v51  ;;  %3627 = vmatprep.subr.bf16.mxu0 %v4078_v52  ;;  %v4134_v51 = vcombine.high %v265_v62, %v269_v2  ;;  %v4136_v52 = vcombine.high %v266_v50, %v270_v63  ;;  %v325_v62 = vld [vmem:[#allocation8 + $0x430] sm:$0xff]  ;;  %v322_v2 = vld [vmem:[#allocation8 + $0x418] sm:$0xff] }
 0x19f   :  { %3799 = vmatprep.subr.bf16.mxu1 %v4080_v53  ;;  %v273_v53 = vld [vmem:[#allocation8 + $0x290] sm:$0xff] }
 0x1a0   :  { %v4141_v8 = vcombine.low %v273_v53, %v277_v54 }
 0x1a1   :  { %3628 = vmatpush1.bf16.msra.mxu0 %v4077_v58  ;;  %v4135_v58 = vcombine.low %v266_v50, %v270_v63  ;;  %v326_v50 = vld [vmem:[#allocation8 + $0x438] sm:$0xff] }
 0x1a2   :  { %3800 = vmatpush1.bf16.msra.mxu1 %v4079_v59  ;;  %3629 = vmatprep.subr.bf16.mxu0 %v4086_v60  ;;  %v4142_v59 = vcombine.high %v273_v53, %v277_v54  ;;  %v4144_v60 = vcombine.high %v274_v55, %v278_v56  ;;  %v333_v53 = vld [vmem:[#allocation8 + $0x470] sm:$0xff] }
 0x1a3   :  { %3801 = vmatprep.subr.bf16.mxu1 %v4088_v1  ;;  %v281_v1 = vld [vmem:[#allocation8 + $0x2d0] sm:$0xff] }
 0x1a4   :  { %v4149_v16 = vcombine.low %v281_v1, %v285_v4 }
 0x1a5   :  { %3630 = vmatpush1.bf16.msra.mxu0 %v4085_v17  ;;  %v4143_v17 = vcombine.low %v274_v55, %v278_v56  ;;  %v330_v55 = vld [vmem:[#allocation8 + $0x458] sm:$0xff] }
 0x1a6   :  { %3802 = vmatpush1.bf16.msra.mxu1 %v4087_v9  ;;  %3631 = vmatprep.subr.bf16.mxu0 %v4094_v10  ;;  %v4150_v9 = vcombine.high %v281_v1, %v285_v4  ;;  %v4152_v10 = vcombine.high %v282_v6, %v286_v7  ;;  %v334_v56 = vld [vmem:[#allocation8 + $0x478] sm:$0xff] }
 0x1a7   :  { %3803 = vmatprep.subr.bf16.mxu1 %v4096_v11  ;;  %v289_v11 = vld [vmem:[#allocation8 + $0x310] sm:$0xff]  ;;  %v4200_v1 = vcombine.high %v330_v55, %v334_v56  ;;  %v338_v4 = vld [vmem:[#allocation8 + $0x498] sm:$0xff] }
 0x1a8   :  { %v4157_v27 = vcombine.low %v289_v11, %v293_v12 }
 0x1a9   :  { %3632 = vmatpush1.bf16.msra.mxu0 %v4093_v19  ;;  %v4151_v19 = vcombine.low %v282_v6, %v286_v7  ;;  %v342_v6 = vld [vmem:[#allocation8 + $0x4b8] sm:$0xff] }
 0x1aa   :  { %3804 = vmatpush1.bf16.msra.mxu1 %v4095_v20  ;;  %3633 = vmatprep.subr.bf16.mxu0 %v4102_v21  ;;  %v4158_v20 = vcombine.high %v289_v11, %v293_v12  ;;  %v4160_v21 = vcombine.high %v290_v13, %v294_v15  ;;  %v349_v11 = vld [vmem:[#allocation8 + $0x4f0] sm:$0xff]  ;;  %v346_v12 = vld [vmem:[#allocation8 + $0x4d8] sm:$0xff] }
 0x1ab   :  { %3805 = vmatprep.subr.bf16.mxu1 %v4104_v26  ;;  %v297_v26 = vld [vmem:[#allocation8 + $0x350] sm:$0xff] }
 0x1ac   :  { %v4165_v36 = vcombine.low %v297_v26, %v301_v22 }
 0x1ad   :  { %3634 = vmatpush1.bf16.msra.mxu0 %v4101_v49  ;;  %v4159_v49 = vcombine.low %v290_v13, %v294_v15  ;;  %v350_v13 = vld [vmem:[#allocation8 + $0x4f8] sm:$0xff] }
 0x1ae   :  { %3806 = vmatpush1.bf16.msra.mxu1 %v4103_v25  ;;  %3635 = vmatprep.subr.bf16.mxu0 %v4110_v48  ;;  %v4166_v25 = vcombine.high %v297_v26, %v301_v22  ;;  %v4168_v48 = vcombine.high %v298_v23, %v302_v24  ;;  %v354_v26 = vld [vmem:[#allocation8 + $0x518] sm:$0xff] }
 0x1af   :  { %3807 = vmatprep.subr.bf16.mxu1 %v4112_v31  ;;  %v305_v31 = vld [vmem:[#allocation8 + $0x390] sm:$0xff]  ;;  %v358_v22 = vld [vmem:[#allocation8 + $0x538] sm:$0xff] }
 0x1b0   :  { %v4173_v44 = vcombine.low %v305_v31, %v309_v32 }
 0x1b1   :  { %3636 = vmatpush1.bf16.msra.mxu0 %v4109_v37  ;;  %v4167_v37 = vcombine.low %v298_v23, %v302_v24  ;;  %v4215_v23 = vcombine.low %v346_v12, %v350_v13 }
 0x1b2   :  { %3808 = vmatpush1.bf16.msra.mxu1 %v4111_v38  ;;  %3637 = vmatprep.subr.bf16.mxu0 %v4118_v39  ;;  %v4174_v38 = vcombine.high %v305_v31, %v309_v32  ;;  %v4176_v39 = vcombine.high %v306_v33, %v310_v34  ;;  %v366_v31 = vld [vmem:[#allocation8 + $0x578] sm:$0xff] }
 0x1b3   :  { %3809 = vmatprep.subr.bf16.mxu1 %v4120_v40  ;;  %v313_v40 = vld [vmem:[#allocation8 + $0x3d0] sm:$0xff] }
 0x1b4   :  { %v4181_v63 = vcombine.low %v313_v40, %v317_v41 }
 0x1b5   :  { %3638 = vmatpush1.bf16.msra.mxu0 %v4117_v45  ;;  %v4175_v45 = vcombine.low %v306_v33, %v310_v34  ;;  %v4223_v33 = vcombine.low %v354_v26, %v358_v22 }
 0x1b6   :  { %3810 = vmatpush1.bf16.msra.mxu1 %v4119_v46  ;;  %3639 = vmatprep.subr.bf16.mxu0 %v4126_v47  ;;  %v4182_v46 = vcombine.high %v313_v40, %v317_v41  ;;  %v4184_v47 = vcombine.high %v314_v42, %v318_v43  ;;  %v374_v40 = vld [vmem:[#allocation8 + $0x5b8] sm:$0xff] }
 0x1b7   :  { %3811 = vmatprep.subr.bf16.mxu1 %v4128_v61  ;;  %v321_v61 = vld [vmem:[#allocation8 + $0x410] sm:$0xff] }
 0x1b8   :  { %v4189_v54 = vcombine.low %v321_v61, %v325_v62 }
 0x1b9   :  { %3640 = vmatpush1.bf16.msra.mxu0 %v4125_v3  ;;  %v4183_v3 = vcombine.low %v314_v42, %v318_v43 }
 0x1ba   :  { %3812 = vmatpush1.bf16.msra.mxu1 %v4127_v5  ;;  %3641 = vmatprep.subr.bf16.mxu0 %v4134_v51  ;;  %v4190_v5 = vcombine.high %v321_v61, %v325_v62  ;;  %v4192_v51 = vcombine.high %v322_v2, %v326_v50  ;;  %v382_v61 = vld [vmem:[#allocation8 + $0x5f8] sm:$0xff] }
 0x1bb   :  { %3813 = vmatprep.subr.bf16.mxu1 %v4136_v52  ;;  %v329_v52 = vld [vmem:[#allocation8 + $0x450] sm:$0xff] }
 0x1bc   :  { %v4197_v7 = vcombine.low %v329_v52, %v333_v53 }
 0x1bd   :  { %3642 = vmatpush1.bf16.msra.mxu0 %v4133_v57  ;;  %v4191_v57 = vcombine.low %v322_v2, %v326_v50 }
 0x1be   :  { %3814 = vmatpush1.bf16.msra.mxu1 %v4135_v58  ;;  %3643 = vmatprep.subr.bf16.mxu0 %v4142_v59  ;;  %v4198_v58 = vcombine.high %v329_v52, %v333_v53  ;;  %v337_v59 = vld [vmem:[#allocation8 + $0x490] sm:$0xff]  ;;  %v390_v52 = vld [vmem:[#allocation8 + $0x638] sm:$0xff] }
 0x1bf   :  { %3815 = vmatprep.subr.bf16.mxu1 %v4144_v60  ;;  %v341_v60 = vld [vmem:[#allocation8 + $0x4b0] sm:$0xff] }
 0x1c0   :  { %v4205_v15 = vcombine.low %v337_v59, %v341_v60 }
 0x1c1   :  { %3644 = vmatpush1.bf16.msra.mxu0 %v4141_v8  ;;  %v4199_v8 = vcombine.low %v330_v55, %v334_v56 }
 0x1c2   :  { %3816 = vmatpush1.bf16.msra.mxu1 %v4143_v17  ;;  %3645 = vmatprep.subr.bf16.mxu0 %v4150_v9  ;;  %v4206_v17 = vcombine.high %v337_v59, %v341_v60  ;;  %v4208_v9 = vcombine.high %v338_v4, %v342_v6  ;;  %v394_v59 = vld [vmem:[#allocation8 + $0x658] sm:$0xff] }
 0x1c3   :  { %3817 = vmatprep.subr.bf16.mxu1 %v4152_v10  ;;  %v345_v10 = vld [vmem:[#allocation8 + $0x4d0] sm:$0xff]  ;;  %v398_v60 = vld [vmem:[#allocation8 + $0x678] sm:$0xff] }
 0x1c5   :  { %3646 = vmatpush1.bf16.msra.mxu0 %v4149_v16  ;;  %v4214_v16 = vcombine.high %v345_v10, %v349_v11 }
 0x1c6   :  { %3818 = vmatpush1.bf16.msra.mxu1 %v4151_v19  ;;  %3647 = vmatprep.subr.bf16.mxu0 %v4158_v20  ;;  %v4216_v19 = vcombine.high %v346_v12, %v350_v13  ;;  %v353_v20 = vld [vmem:[#allocation8 + $0x510] sm:$0xff]  ;;  %v4263_v12 = vcombine.low %v394_v59, %v398_v60 }
 0x1c7   :  { %3819 = vmatprep.subr.bf16.mxu1 %v4160_v21  ;;  %v357_v21 = vld [vmem:[#allocation8 + $0x530] sm:$0xff] }
 0x1c8   :  { %v4222_v24 = vcombine.high %v353_v20, %v357_v21  ;;  %v4221_v32 = vcombine.low %v353_v20, %v357_v21  ;;  %v414_v20 = vld [vmem:[#allocation8 + $0x6f8] sm:$0xff] }
 0x1c9   :  { %3648 = vmatpush1.bf16.msra.mxu0 %v4157_v27  ;;  %v4224_v27 = vcombine.high %v354_v26, %v358_v22 }
 0x1ca   :  { %3820 = vmatpush1.bf16.msra.mxu1 %v4159_v49  ;;  %3649 = vmatprep.subr.bf16.mxu0 %v4166_v25  ;;  %v361_v49 = vld [vmem:[#allocation8 + $0x550] sm:$0xff] }
 0x1cb   :  { %3821 = vmatprep.subr.bf16.mxu1 %v4168_v48  ;;  %v365_v25 = vld [vmem:[#allocation8 + $0x570] sm:$0xff]  ;;  %v362_v48 = vld [vmem:[#allocation8 + $0x558] sm:$0xff] }
 0x1cc   :  { %v4230_v34 = vcombine.high %v361_v49, %v365_v25  ;;  %v4229_v41 = vcombine.low %v361_v49, %v365_v25  ;;  %v4231_v42 = vcombine.low %v362_v48, %v366_v31  ;;  %v422_v49 = vld [vmem:[#allocation8 + $0x738] sm:$0xff] }
 0x1cd   :  { %3650 = vmatpush1.bf16.msra.mxu0 %v4165_v36  ;;  %v4232_v36 = vcombine.high %v362_v48, %v366_v31 }
 0x1ce   :  { %3822 = vmatpush1.bf16.msra.mxu1 %v4167_v37  ;;  %3651 = vmatprep.subr.bf16.mxu0 %v4174_v38  ;;  %v369_v37 = vld [vmem:[#allocation8 + $0x590] sm:$0xff] }
 0x1cf   :  { %3823 = vmatprep.subr.bf16.mxu1 %v4176_v39  ;;  %v373_v38 = vld [vmem:[#allocation8 + $0x5b0] sm:$0xff]  ;;  %v370_v39 = vld [vmem:[#allocation8 + $0x598] sm:$0xff] }
 0x1d0   :  { %v4238_v43 = vcombine.high %v369_v37, %v373_v38  ;;  %v4237_v62 = vcombine.low %v369_v37, %v373_v38  ;;  %v4239_v2 = vcombine.low %v370_v39, %v374_v40  ;;  %v430_v37 = vld [vmem:[#allocation8 + $0x778] sm:$0xff] }
 0x1d1   :  { %3652 = vmatpush1.bf16.msra.mxu0 %v4173_v44  ;;  %v4240_v44 = vcombine.high %v370_v39, %v374_v40 }
 0x1d2   :  { %3824 = vmatpush1.bf16.msra.mxu1 %v4175_v45  ;;  %3653 = vmatprep.subr.bf16.mxu0 %v4182_v46  ;;  %v377_v45 = vld [vmem:[#allocation8 + $0x5d0] sm:$0xff] }
 0x1d3   :  { %3825 = vmatprep.subr.bf16.mxu1 %v4184_v47  ;;  %v381_v46 = vld [vmem:[#allocation8 + $0x5f0] sm:$0xff]  ;;  %v378_v47 = vld [vmem:[#allocation8 + $0x5d8] sm:$0xff] }
 0x1d4   :  { %v4246_v50 = vcombine.high %v377_v45, %v381_v46  ;;  %v4245_v53 = vcombine.low %v377_v45, %v381_v46  ;;  %v438_v45 = vld [vmem:[#allocation8 + $0x7b8] sm:$0xff] }
 0x1d5   :  { %3654 = vmatpush1.bf16.msra.mxu0 %v4181_v63  ;;  %v4248_v63 = vcombine.high %v378_v47, %v382_v61 }
 0x1d6   :  { %3826 = vmatpush1.bf16.msra.mxu1 %v4183_v3  ;;  %3666 = vmatprep.subr.bf16.mxu0 %v4190_v5  ;;  %v385_v3 = vld [vmem:[#allocation8 + $0x610] sm:$0xff] }
 0x1d7   :  { %3838 = vmatprep.subr.bf16.mxu1 %v4192_v51  ;;  %v389_v5 = vld [vmem:[#allocation8 + $0x630] sm:$0xff]  ;;  %v386_v51 = vld [vmem:[#allocation8 + $0x618] sm:$0xff] }
 0x1d8   :  { %3656 = vmatmul.mubr.bf16.vlgmr.msra.gmra.mrb[4].mxu0 %v4939_v18  ;;  %v4254_v55 = vcombine.high %v385_v3, %v389_v5  ;;  %v4256_v56 = vcombine.high %v386_v51, %v390_v52 }
 0x1d9   :  { %3828 = vmatmul.mubr.bf16.vlgmr.msra.gmra.mrb[4].mxu1 %v4939_v18  ;;  %3667 = vmatpush1.bf16.msra.mxu0 %v4189_v54  ;;  %v4207_v18 = vcombine.low %v338_v4, %v342_v6  ;;  %v4247_v54 = vcombine.low %v378_v47, %v382_v61  ;;  %v4255_v4 = vcombine.low %v386_v51, %v390_v52 }
 0x1da   :  { %3698 = vmatprep.mubr.bf16.mxu0 %v4948_v30  ;;  %3839 = vmatpush1.bf16.msra.mxu1 %v4191_v57  ;;  %v393_v57 = vld [vmem:[#allocation8 + $0x650] sm:$0xff] }
 0x1db   :  { %3870 = vmatprep.mubr.bf16.mxu1 %v4948_v30  ;;  %3668 = vmatprep.subr.bf16.mxu0 %v4198_v58  ;;  %v4213_v30 = vcombine.low %v345_v10, %v349_v11  ;;  %v397_v58 = vld [vmem:[#allocation8 + $0x670] sm:$0xff]  ;;  %v406_v10 = vld [vmem:[#allocation8 + $0x6b8] sm:$0xff] }
 0x1dc   :  { %3840 = vmatprep.subr.bf16.mxu1 %v4200_v1  ;;  %v4253_v1 = vcombine.low %v385_v3, %v389_v5  ;;  %v4262_v6 = vcombine.high %v393_v57, %v397_v58  ;;  %v4261_v11 = vcombine.low %v393_v57, %v397_v58  ;;  %v446_v3 = vld [vmem:[#allocation8 + $0x7f8] sm:$0xff] }
 0x1dd   :  { %3669 = vmatpush1.bf16.msra.mxu0 %v4197_v7  ;;  %v4264_v7 = vcombine.high %v394_v59, %v398_v60  ;;  %v454_v57 = vld [vmem:[#allocation8 + $0x838] sm:$0xff] }
 0x1de   :  { %3841 = vmatpush1.bf16.msra.mxu1 %v4199_v8  ;;  %3670 = vmatprep.subr.bf16.mxu0 %v4206_v17  ;;  %v401_v8 = vld [vmem:[#allocation8 + $0x690] sm:$0xff] }
 0x1df   :  { %3842 = vmatprep.subr.bf16.mxu1 %v4208_v9  ;;  %v405_v17 = vld [vmem:[#allocation8 + $0x6b0] sm:$0xff]  ;;  %v402_v9 = vld [vmem:[#allocation8 + $0x698] sm:$0xff] }
 0x1e0   :  { %v4270_v13 = vcombine.high %v401_v8, %v405_v17  ;;  %v4269_v21 = vcombine.low %v401_v8, %v405_v17  ;;  %v4271_v26 = vcombine.low %v402_v9, %v406_v10  ;;  %v458_v8 = vld [vmem:[#allocation8 + $0x858] sm:$0xff] }
 0x1e1   :  { %3671 = vmatpush1.bf16.msra.mxu0 %v4205_v15  ;;  %v4272_v15 = vcombine.high %v402_v9, %v406_v10  ;;  %v462_v17 = vld [vmem:[#allocation8 + $0x878] sm:$0xff] }
 0x1e2   :  { %3843 = vmatpush1.bf16.msra.mxu1 %v4207_v18  ;;  %3672 = vmatprep.subr.bf16.mxu0 %v4214_v16  ;;  %v409_v18 = vld [vmem:[#allocation8 + $0x6d0] sm:$0xff] }
 0x1e3   :  { %3844 = vmatprep.subr.bf16.mxu1 %v4216_v19  ;;  %v413_v16 = vld [vmem:[#allocation8 + $0x6f0] sm:$0xff]  ;;  %v410_v19 = vld [vmem:[#allocation8 + $0x6d8] sm:$0xff] }
 0x1e4   :  { %v4278_v22 = vcombine.high %v409_v18, %v413_v16  ;;  %v4277_v25 = vcombine.low %v409_v18, %v413_v16  ;;  %v4279_v48 = vcombine.low %v410_v19, %v414_v20  ;;  %v470_v18 = vld [vmem:[#allocation8 + $0x8b8] sm:$0xff] }
 0x1e5   :  { %3673 = vmatpush1.bf16.msra.mxu0 %v4213_v30  ;;  %v4280_v30 = vcombine.high %v410_v19, %v414_v20  ;;  %v4327_v19 = vcombine.low %v458_v8, %v462_v17 }
 0x1e6   :  { %3845 = vmatpush1.bf16.msra.mxu1 %v4215_v23  ;;  %3674 = vmatprep.subr.bf16.mxu0 %v4222_v24  ;;  %v417_v23 = vld [vmem:[#allocation8 + $0x710] sm:$0xff] }
 0x1e7   :  { %3846 = vmatprep.subr.bf16.mxu1 %v4224_v27  ;;  %v421_v24 = vld [vmem:[#allocation8 + $0x730] sm:$0xff]  ;;  %v418_v27 = vld [vmem:[#allocation8 + $0x718] sm:$0xff] }
 0x1e8   :  { %v4286_v31 = vcombine.high %v417_v23, %v421_v24  ;;  %v4285_v38 = vcombine.low %v417_v23, %v421_v24  ;;  %v4287_v39 = vcombine.low %v418_v27, %v422_v49  ;;  %v478_v23 = vld [vmem:[#allocation8 + $0x8f8] sm:$0xff] }
 0x1e9   :  { %3675 = vmatpush1.bf16.msra.mxu0 %v4221_v32  ;;  %v4288_v32 = vcombine.high %v418_v27, %v422_v49 }
 0x1ea   :  { %3847 = vmatpush1.bf16.msra.mxu1 %v4223_v33  ;;  %3676 = vmatprep.subr.bf16.mxu0 %v4230_v34  ;;  %v425_v33 = vld [vmem:[#allocation8 + $0x750] sm:$0xff] }
 0x1eb   :  { %3848 = vmatprep.subr.bf16.mxu1 %v4232_v36  ;;  %v429_v34 = vld [vmem:[#allocation8 + $0x770] sm:$0xff]  ;;  %v426_v36 = vld [vmem:[#allocation8 + $0x758] sm:$0xff] }
 0x1ec   :  { %v4294_v40 = vcombine.high %v425_v33, %v429_v34  ;;  %v4293_v46 = vcombine.low %v425_v33, %v429_v34  ;;  %v4295_v47 = vcombine.low %v426_v36, %v430_v37 }
 0x1ed   :  { %3677 = vmatpush1.bf16.msra.mxu0 %v4229_v41  ;;  %v4296_v41 = vcombine.high %v426_v36, %v430_v37  ;;  %v489_v37 = vld [vmem:[#allocation8 + $0x950] sm:$0xff] }
 0x1ee   :  { %3849 = vmatpush1.bf16.msra.mxu1 %v4231_v42  ;;  %3678 = vmatprep.subr.bf16.mxu0 %v4238_v43  ;;  %v433_v42 = vld [vmem:[#allocation8 + $0x790] sm:$0xff] }
 0x1ef   :  { %3850 = vmatprep.subr.bf16.mxu1 %v4240_v44  ;;  %v437_v43 = vld [vmem:[#allocation8 + $0x7b0] sm:$0xff]  ;;  %v434_v44 = vld [vmem:[#allocation8 + $0x798] sm:$0xff] }
 0x1f0   :  { %v4302_v61 = vcombine.high %v433_v42, %v437_v43  ;;  %v4301_v5 = vcombine.low %v433_v42, %v437_v43  ;;  %v4303_v51 = vcombine.low %v434_v44, %v438_v45 }
 0x1f1   :  { %3679 = vmatpush1.bf16.msra.mxu0 %v4237_v62  ;;  %v4304_v62 = vcombine.high %v434_v44, %v438_v45  ;;  %v497_v45 = vld [vmem:[#allocation8 + $0x990] sm:$0xff] }
 0x1f2   :  { %3851 = vmatpush1.bf16.msra.mxu1 %v4239_v2  ;;  %3680 = vmatprep.subr.bf16.mxu0 %v4246_v50  ;;  %v441_v2 = vld [vmem:[#allocation8 + $0x7d0] sm:$0xff] }
 0x1f3   :  { %3852 = vmatprep.subr.bf16.mxu1 %v4248_v63  ;;  %v445_v50 = vld [vmem:[#allocation8 + $0x7f0] sm:$0xff]  ;;  %v442_v63 = vld [vmem:[#allocation8 + $0x7d8] sm:$0xff] }
 0x1f4   :  { %v4310_v52 = vcombine.high %v441_v2, %v445_v50  ;;  %v4309_v58 = vcombine.low %v441_v2, %v445_v50  ;;  %v4311_v59 = vcombine.low %v442_v63, %v446_v3 }
 0x1f5   :  { %3681 = vmatpush1.bf16.msra.mxu0 %v4245_v53  ;;  %v4312_v53 = vcombine.high %v442_v63, %v446_v3  ;;  %v505_v3 = vld [vmem:[#allocation8 + $0x9d0] sm:$0xff] }
 0x1f6   :  { %3853 = vmatpush1.bf16.msra.mxu1 %v4247_v54  ;;  %3682 = vmatprep.subr.bf16.mxu0 %v4254_v55  ;;  %v449_v54 = vld [vmem:[#allocation8 + $0x810] sm:$0xff] }
 0x1f7   :  { %3854 = vmatprep.subr.bf16.mxu1 %v4256_v56  ;;  %v453_v55 = vld [vmem:[#allocation8 + $0x830] sm:$0xff]  ;;  %v450_v56 = vld [vmem:[#allocation8 + $0x818] sm:$0xff] }
 0x1f8   :  { %v4318_v60 = vcombine.high %v449_v54, %v453_v55  ;;  %v4319_v9 = vcombine.low %v450_v56, %v454_v57 }
 0x1f9   :  { %3683 = vmatpush1.bf16.msra.mxu0 %v4253_v1  ;;  %v4320_v1 = vcombine.high %v450_v56, %v454_v57  ;;  %v513_v57 = vld [vmem:[#allocation8 + $0xa10] sm:$0xff] }
 0x1fa   :  { %3855 = vmatpush1.bf16.msra.mxu1 %v4255_v4  ;;  %3684 = vmatprep.subr.bf16.mxu0 %v4262_v6  ;;  %v457_v4 = vld [vmem:[#allocation8 + $0x850] sm:$0xff] }
 0x1fb   :  { %3856 = vmatprep.subr.bf16.mxu1 %v4264_v7  ;;  %v461_v6 = vld [vmem:[#allocation8 + $0x870] sm:$0xff]  ;;  %v4317_v7 = vcombine.low %v449_v54, %v453_v55 }
 0x1fc   :  { %v4326_v10 = vcombine.high %v457_v4, %v461_v6  ;;  %v4325_v16 = vcombine.low %v457_v4, %v461_v6 }
 0x1fd   :  { %3685 = vmatpush1.bf16.msra.mxu0 %v4261_v11  ;;  %v465_v11 = vld [vmem:[#allocation8 + $0x890] sm:$0xff] }
 0x1fe   :  { %3857 = vmatpush1.bf16.msra.mxu1 %v4263_v12  ;;  %3686 = vmatprep.subr.bf16.mxu0 %v4270_v13  ;;  %v469_v12 = vld [vmem:[#allocation8 + $0x8b0] sm:$0xff]  ;;  %v4328_v13 = vcombine.high %v458_v8, %v462_v17 }
 0x1ff   :  { %3858 = vmatprep.subr.bf16.mxu1 %v4272_v15  ;;  %v466_v15 = vld [vmem:[#allocation8 + $0x898] sm:$0xff]  ;;  %v4334_v20 = vcombine.high %v465_v11, %v469_v12  ;;  %v4333_v24 = vcombine.low %v465_v11, %v469_v12  ;;  %v521_v8 = vld [vmem:[#allocation8 + $0xa50] sm:$0xff] }
 0x200   :  { %v525_v17 = vld [vmem:[#allocation8 + $0xa70] sm:$0xff] }
 0x201   :  { %3687 = vmatpush1.bf16.msra.mxu0 %v4269_v21  ;;  %v4336_v21 = vcombine.high %v466_v15, %v470_v18 }
 0x202   :  { %3859 = vmatpush1.bf16.msra.mxu1 %v4271_v26  ;;  %3688 = vmatprep.subr.bf16.mxu0 %v4278_v22  ;;  %v473_v26 = vld [vmem:[#allocation8 + $0x8d0] sm:$0xff] }
 0x203   :  { %3860 = vmatprep.subr.bf16.mxu1 %v4280_v30  ;;  %v477_v22 = vld [vmem:[#allocation8 + $0x8f0] sm:$0xff]  ;;  %v474_v30 = vld [vmem:[#allocation8 + $0x8d8] sm:$0xff] }
 0x204   :  { %v4342_v27 = vcombine.high %v473_v26, %v477_v22  ;;  %v4344_v49 = vcombine.high %v474_v30, %v478_v23  ;;  %v4343_v33 = vcombine.low %v474_v30, %v478_v23  ;;  %v537_v23 = vld [vmem:[#allocation8 + $0xad0] sm:$0xff] }
 0x205   :  { %3689 = vmatpush1.bf16.msra.mxu0 %v4277_v25  ;;  %v481_v25 = vld [vmem:[#allocation8 + $0x910] sm:$0xff] }
 0x206   :  { %3861 = vmatpush1.bf16.msra.mxu1 %v4279_v48  ;;  %3690 = vmatprep.subr.bf16.mxu0 %v4286_v31  ;;  %v485_v48 = vld [vmem:[#allocation8 + $0x930] sm:$0xff]  ;;  %v482_v31 = vld [vmem:[#allocation8 + $0x918] sm:$0xff] }
 0x207   :  { %3862 = vmatprep.subr.bf16.mxu1 %v4288_v32  ;;  %v486_v32 = vld [vmem:[#allocation8 + $0x938] sm:$0xff]  ;;  %v4350_v34 = vcombine.high %v481_v25, %v485_v48 }
 0x208   :  { %v4352_v36 = vcombine.high %v482_v31, %v486_v32  ;;  %v4351_v42 = vcombine.low %v482_v31, %v486_v32  ;;  %v545_v32 = vld [vmem:[#allocation8 + $0xb10] sm:$0xff] }
 0x209   :  { %3691 = vmatpush1.bf16.msra.mxu0 %v4285_v38  ;;  %v493_v38 = vld [vmem:[#allocation8 + $0x970] sm:$0xff] }
 0x20a   :  { %3863 = vmatpush1.bf16.msra.mxu1 %v4287_v39  ;;  %3692 = vmatprep.subr.bf16.mxu0 %v4294_v40  ;;  %v490_v39 = vld [vmem:[#allocation8 + $0x958] sm:$0xff]  ;;  %v4358_v43 = vcombine.high %v489_v37, %v493_v38 }
 0x20b   :  { %3864 = vmatprep.subr.bf16.mxu1 %v4296_v41  ;;  %v494_v40 = vld [vmem:[#allocation8 + $0x978] sm:$0xff]  ;;  %v4349_v41 = vcombine.low %v481_v25, %v485_v48 }
 0x20c   :  { %v4360_v44 = vcombine.high %v490_v39, %v494_v40  ;;  %v4359_v2 = vcombine.low %v490_v39, %v494_v40  ;;  %v553_v40 = vld [vmem:[#allocation8 + $0xb50] sm:$0xff] }
 0x20d   :  { %3693 = vmatpush1.bf16.msra.mxu0 %v4293_v46  ;;  %v501_v46 = vld [vmem:[#allocation8 + $0x9b0] sm:$0xff] }
 0x20e   :  { %3865 = vmatpush1.bf16.msra.mxu1 %v4295_v47  ;;  %3694 = vmatprep.subr.bf16.mxu0 %v4302_v61  ;;  %v498_v47 = vld [vmem:[#allocation8 + $0x998] sm:$0xff]  ;;  %v4366_v50 = vcombine.high %v497_v45, %v501_v46 }
 0x20f   :  { %3866 = vmatprep.subr.bf16.mxu1 %v4304_v62  ;;  %v502_v61 = vld [vmem:[#allocation8 + $0x9b8] sm:$0xff]  ;;  %v4357_v62 = vcombine.low %v489_v37, %v493_v38 }
 0x210   :  { %v4368_v63 = vcombine.high %v498_v47, %v502_v61  ;;  %v4367_v54 = vcombine.low %v498_v47, %v502_v61  ;;  %v561_v61 = vld [vmem:[#allocation8 + $0xb90] sm:$0xff] }
 0x211   :  { %3695 = vmatpush1.bf16.msra.mxu0 %v4301_v5  ;;  %v509_v5 = vld [vmem:[#allocation8 + $0x9f0] sm:$0xff] }
 0x212   :  { %3867 = vmatpush1.bf16.msra.mxu1 %v4303_v51  ;;  %3696 = vmatprep.subr.bf16.mxu0 %v4310_v52  ;;  %v506_v51 = vld [vmem:[#allocation8 + $0x9d8] sm:$0xff]  ;;  %v4374_v55 = vcombine.high %v505_v3, %v509_v5 }
 0x213   :  { %3868 = vmatprep.subr.bf16.mxu1 %v4312_v53  ;;  %v510_v52 = vld [vmem:[#allocation8 + $0x9f8] sm:$0xff]  ;;  %v4365_v53 = vcombine.low %v497_v45, %v501_v46 }
 0x214   :  { %v4376_v56 = vcombine.high %v506_v51, %v510_v52  ;;  %v4375_v4 = vcombine.low %v506_v51, %v510_v52  ;;  %v569_v52 = vld [vmem:[#allocation8 + $0xbd0] sm:$0xff] }
 0x215   :  { %3697 = vmatpush1.bf16.msra.mxu0 %v4309_v58  ;;  %v517_v58 = vld [vmem:[#allocation8 + $0xa30] sm:$0xff] }
 0x216   :  { %3869 = vmatpush1.bf16.msra.mxu1 %v4311_v59  ;;  %3709 = vmatprep.subr.bf16.mxu0 %v4318_v60  ;;  %v514_v59 = vld [vmem:[#allocation8 + $0xa18] sm:$0xff]  ;;  %v4382_v6 = vcombine.high %v513_v57, %v517_v58  ;;  %v4381_v11 = vcombine.low %v513_v57, %v517_v58 }
 0x217   :  { %3881 = vmatprep.subr.bf16.mxu1 %v4320_v1  ;;  %v518_v60 = vld [vmem:[#allocation8 + $0xa38] sm:$0xff]  ;;  %v4373_v1 = vcombine.low %v505_v3, %v509_v5 }
 0x218   :  { %3699 = vmatmul.mubr.bf16.vlgmr.msra.gmra.mrb[4].mxu0 %v4944_v28  ;;  %v4383_v12 = vcombine.low %v514_v59, %v518_v60 }
 0x219   :  { %3871 = vmatmul.mubr.bf16.vlgmr.msra.gmra.mrb[4].mxu1 %v4944_v28  ;;  %3710 = vmatpush1.bf16.msra.mxu0 %v4317_v7  ;;  %v4335_v28 = vcombine.low %v466_v15, %v470_v18  ;;  %v4384_v7 = vcombine.high %v514_v59, %v518_v60  ;;  %v529_v18 = vld [vmem:[#allocation8 + $0xa90] sm:$0xff] }
 0x21a   :  { %3741 = vmatprep.mubr.bf16.mxu0 %v4950_v35  ;;  %3882 = vmatpush1.bf16.msra.mxu1 %v4319_v9  ;;  %v522_v9 = vld [vmem:[#allocation8 + $0xa58] sm:$0xff]  ;;  %v577_v60 = vld [vmem:[#allocation8 + $0xc10] sm:$0xff] }
 0x21b   :  { %3913 = vmatprep.mubr.bf16.mxu1 %v4950_v35  ;;  %3711 = vmatprep.subr.bf16.mxu0 %v4326_v10  ;;  %v4341_v35 = vcombine.low %v473_v26, %v477_v22  ;;  %v526_v10 = vld [vmem:[#allocation8 + $0xa78] sm:$0xff] }
 0x21c   :  { %3883 = vmatprep.subr.bf16.mxu1 %v4328_v13  ;;  %v4390_v13 = vcombine.high %v521_v8, %v525_v17  ;;  %v4392_v15 = vcombine.high %v522_v9, %v526_v10  ;;  %v4391_v26 = vcombine.low %v522_v9, %v526_v10  ;;  %v585_v10 = vld [vmem:[#allocation8 + $0xc50] sm:$0xff] }
 0x21d   :  { %3712 = vmatpush1.bf16.msra.mxu0 %v4325_v16  ;;  %v533_v16 = vld [vmem:[#allocation8 + $0xab0] sm:$0xff] }
 0x21e   :  { %3884 = vmatpush1.bf16.msra.mxu1 %v4327_v19  ;;  %3713 = vmatprep.subr.bf16.mxu0 %v4334_v20  ;;  %v530_v19 = vld [vmem:[#allocation8 + $0xa98] sm:$0xff]  ;;  %v4398_v22 = vcombine.high %v529_v18, %v533_v16 }
 0x21f   :  { %3885 = vmatprep.subr.bf16.mxu1 %v4336_v21  ;;  %v534_v20 = vld [vmem:[#allocation8 + $0xab8] sm:$0xff]  ;;  %v4389_v21 = vcombine.low %v521_v8, %v525_v17 }
 0x220   :  { %v4400_v30 = vcombine.high %v530_v19, %v534_v20  ;;  %v4399_v25 = vcombine.low %v530_v19, %v534_v20  ;;  %v593_v19 = vld [vmem:[#allocation8 + $0xc90] sm:$0xff] }
 0x221   :  { %3714 = vmatpush1.bf16.msra.mxu0 %v4333_v24  ;;  %v541_v24 = vld [vmem:[#allocation8 + $0xaf0] sm:$0xff] }
 0x222   :  { %3886 = vmatpush1.bf16.msra.mxu1 %v4335_v28  ;;  %3715 = vmatprep.subr.bf16.mxu0 %v4342_v27  ;;  %v538_v28 = vld [vmem:[#allocation8 + $0xad8] sm:$0xff]  ;;  %v4406_v48 = vcombine.high %v537_v23, %v541_v24  ;;  %v597_v20 = vld [vmem:[#allocation8 + $0xcb0] sm:$0xff] }
 0x223   :  { %3887 = vmatprep.subr.bf16.mxu1 %v4344_v49  ;;  %v542_v27 = vld [vmem:[#allocation8 + $0xaf8] sm:$0xff]  ;;  %v4397_v49 = vcombine.low %v529_v18, %v533_v16 }
 0x224   :  { %v4408_v31 = vcombine.high %v538_v28, %v542_v27  ;;  %v4407_v37 = vcombine.low %v538_v28, %v542_v27  ;;  %v601_v27 = vld [vmem:[#allocation8 + $0xcd0] sm:$0xff] }
 0x225   :  { %3716 = vmatpush1.bf16.msra.mxu0 %v4341_v35  ;;  %v549_v35 = vld [vmem:[#allocation8 + $0xb30] sm:$0xff] }
 0x226   :  { %3888 = vmatpush1.bf16.msra.mxu1 %v4343_v33  ;;  %3717 = vmatprep.subr.bf16.mxu0 %v4350_v34  ;;  %v546_v33 = vld [vmem:[#allocation8 + $0xb18] sm:$0xff]  ;;  %v4414_v38 = vcombine.high %v545_v32, %v549_v35 }
 0x227   :  { %3889 = vmatprep.subr.bf16.mxu1 %v4352_v36  ;;  %v550_v34 = vld [vmem:[#allocation8 + $0xb38] sm:$0xff]  ;;  %v4405_v36 = vcombine.low %v537_v23, %v541_v24  ;;  %v4462_v24 = vcombine.high %v593_v19, %v597_v20 }
 0x228   :  { %v4416_v39 = vcombine.high %v546_v33, %v550_v34  ;;  %v4415_v45 = vcombine.low %v546_v33, %v550_v34  ;;  %v609_v33 = vld [vmem:[#allocation8 + $0xd10] sm:$0xff] }
 0x229   :  { %3718 = vmatpush1.bf16.msra.mxu0 %v4349_v41  ;;  %v557_v41 = vld [vmem:[#allocation8 + $0xb70] sm:$0xff] }
 0x22a   :  { %3890 = vmatpush1.bf16.msra.mxu1 %v4351_v42  ;;  %3719 = vmatprep.subr.bf16.mxu0 %v4358_v43  ;;  %v554_v42 = vld [vmem:[#allocation8 + $0xb58] sm:$0xff]  ;;  %v4422_v46 = vcombine.high %v553_v40, %v557_v41  ;;  %v613_v34 = vld [vmem:[#allocation8 + $0xd30] sm:$0xff] }
 0x22b   :  { %3891 = vmatprep.subr.bf16.mxu1 %v4360_v44  ;;  %v558_v43 = vld [vmem:[#allocation8 + $0xb78] sm:$0xff]  ;;  %v4413_v44 = vcombine.low %v545_v32, %v549_v35 }
 0x22c   :  { %v4424_v47 = vcombine.high %v554_v42, %v558_v43  ;;  %v4423_v3 = vcombine.low %v554_v42, %v558_v43  ;;  %v621_v42 = vld [vmem:[#allocation8 + $0xd70] sm:$0xff]  ;;  %v618_v43 = vld [vmem:[#allocation8 + $0xd58] sm:$0xff] }
 0x22d   :  { %3720 = vmatpush1.bf16.msra.mxu0 %v4357_v62  ;;  %v565_v62 = vld [vmem:[#allocation8 + $0xbb0] sm:$0xff] }
 0x22e   :  { %3892 = vmatpush1.bf16.msra.mxu1 %v4359_v2  ;;  %3721 = vmatprep.subr.bf16.mxu0 %v4366_v50  ;;  %v562_v2 = vld [vmem:[#allocation8 + $0xb98] sm:$0xff]  ;;  %v4430_v5 = vcombine.high %v561_v61, %v565_v62 }
 0x22f   :  { %3893 = vmatprep.subr.bf16.mxu1 %v4368_v63  ;;  %v566_v50 = vld [vmem:[#allocation8 + $0xbb8] sm:$0xff]  ;;  %v4421_v63 = vcombine.low %v553_v40, %v557_v41  ;;  %v617_v41 = vld [vmem:[#allocation8 + $0xd50] sm:$0xff] }
 0x230   :  { %v4432_v51 = vcombine.high %v562_v2, %v566_v50  ;;  %v4431_v57 = vcombine.low %v562_v2, %v566_v50  ;;  %v5007_v2 = vld [vmem:[#allocation8 + $0xd90] sm:$0xff] }
 0x231   :  { %3722 = vmatpush1.bf16.msra.mxu0 %v4365_v53  ;;  %v573_v53 = vld [vmem:[#allocation8 + $0xbf0] sm:$0xff] }
 0x232   :  { %3894 = vmatpush1.bf16.msra.mxu1 %v4367_v54  ;;  %3723 = vmatprep.subr.bf16.mxu0 %v4374_v55  ;;  %v570_v54 = vld [vmem:[#allocation8 + $0xbd8] sm:$0xff]  ;;  %v4438_v58 = vcombine.high %v569_v52, %v573_v53  ;;  %v5009_v50 = vld [vmem:[#allocation8 + $0xdb0] sm:$0xff] }
 0x233   :  { %3895 = vmatprep.subr.bf16.mxu1 %v4376_v56  ;;  %v574_v55 = vld [vmem:[#allocation8 + $0xbf8] sm:$0xff]  ;;  %v4429_v56 = vcombine.low %v561_v61, %v565_v62  ;;  %v703_v61 = vld [vmem:[#allocation7] sm:$0xff] }
 0x234   :  { %v4440_v59 = vcombine.high %v570_v54, %v574_v55  ;;  %v4439_v8 = vcombine.low %v570_v54, %v574_v55  ;;  %v5017_v54 = vld [vmem:[#allocation8 + $0xdf0] sm:$0xff]  ;;  %v5019_v55 = vld [vmem:[#allocation8 + $0xdd8] sm:$0xff] }
 0x235   :  { %3724 = vmatpush1.bf16.msra.mxu0 %v4373_v1  ;;  %v581_v1 = vld [vmem:[#allocation8 + $0xc30] sm:$0xff] }
 0x236   :  { %3896 = vmatpush1.bf16.msra.mxu1 %v4375_v4  ;;  %3725 = vmatprep.subr.bf16.mxu0 %v4382_v6  ;;  %v578_v4 = vld [vmem:[#allocation8 + $0xc18] sm:$0xff]  ;;  %v4446_v17 = vcombine.high %v577_v60, %v581_v1 }
 0x237   :  { %3897 = vmatprep.subr.bf16.mxu1 %v4384_v7  ;;  %v582_v6 = vld [vmem:[#allocation8 + $0xc38] sm:$0xff]  ;;  %v4437_v7 = vcombine.low %v569_v52, %v573_v53  ;;  %v3972_v52 = vld [vmem:[#allocation5] sm:$0xff]  ;;  %v4485_v53 = vcombine.low %v617_v41, %v621_v42 }
 0x238   :  { %v4448_v9 = vcombine.high %v578_v4, %v582_v6  ;;  %v4447_v18 = vcombine.low %v578_v4, %v582_v6  ;;  %v3974_v6 = vld [vmem:[#allocation5 + $0x10] sm:$0xff] }
 0x239   :  { %3726 = vmatpush1.bf16.msra.mxu0 %v4381_v11  ;;  %v589_v11 = vld [vmem:[#allocation8 + $0xc70] sm:$0xff] }
 0x23a   :  { %3898 = vmatpush1.bf16.msra.mxu1 %v4383_v12  ;;  %3727 = vmatprep.subr.bf16.mxu0 %v4390_v13  ;;  %v4445_v12 = vcombine.low %v577_v60, %v581_v1  ;;  %v586_v13 = vld [vmem:[#allocation8 + $0xc58] sm:$0xff]  ;;  %v4454_v16 = vcombine.high %v585_v10, %v589_v11  ;;  %v5025_v60 = vld [vmem:[#allocation8 + $0xe10] sm:$0xff] }
 0x23b   :  { %3899 = vmatprep.subr.bf16.mxu1 %v4392_v15  ;;  %v590_v15 = vld [vmem:[#allocation8 + $0xc78] sm:$0xff]  ;;  %v5027_v1 = vld [vmem:[#allocation8 + $0xe30] sm:$0xff] }
 0x23c   :  { %v4455_v23 = vcombine.low %v586_v13, %v590_v15 }
 0x23d   :  { %3728 = vmatpush1.bf16.msra.mxu0 %v4389_v21  ;;  %v4456_v21 = vcombine.high %v586_v13, %v590_v15  ;;  %v3973_v15 = vld [vmem:[#allocation5 + $0x8] sm:$0xff] }
 0x23e   :  { %3900 = vmatpush1.bf16.msra.mxu1 %v4391_v26  ;;  %3729 = vmatprep.subr.bf16.mxu0 %v4398_v22  ;;  %v594_v26 = vld [vmem:[#allocation8 + $0xc98] sm:$0xff] }
 0x23f   :  { %3901 = vmatprep.subr.bf16.mxu1 %v4400_v30  ;;  %v598_v22 = vld [vmem:[#allocation8 + $0xcb8] sm:$0xff]  ;;  %v4453_v30 = vcombine.low %v585_v10, %v589_v11 }
 0x240   :  { %v4464_v28 = vcombine.high %v594_v26, %v598_v22 }
 0x241   :  { %3730 = vmatpush1.bf16.msra.mxu0 %v4397_v49  ;;  %v605_v49 = vld [vmem:[#allocation8 + $0xcf0] sm:$0xff] }
 0x242   :  { %3902 = vmatpush1.bf16.msra.mxu1 %v4399_v25  ;;  %3731 = vmatprep.subr.bf16.mxu0 %v4406_v48  ;;  %v602_v25 = vld [vmem:[#allocation8 + $0xcd8] sm:$0xff]  ;;  %v4470_v32 = vcombine.high %v601_v27, %v605_v49 }
 0x243   :  { %3903 = vmatprep.subr.bf16.mxu1 %v4408_v31  ;;  %v606_v48 = vld [vmem:[#allocation8 + $0xcf8] sm:$0xff]  ;;  %v4461_v31 = vcombine.low %v593_v19, %v597_v20 }
 0x244   :  { %v4472_v35 = vcombine.high %v602_v25, %v606_v48 }
 0x245   :  { %3732 = vmatpush1.bf16.msra.mxu0 %v4405_v36  ;;  %v610_v36 = vld [vmem:[#allocation8 + $0xd18] sm:$0xff] }
 0x246   :  { %3904 = vmatpush1.bf16.msra.mxu1 %v4407_v37  ;;  %3733 = vmatprep.subr.bf16.mxu0 %v4414_v38  ;;  %v614_v37 = vld [vmem:[#allocation8 + $0xd38] sm:$0xff]  ;;  %v4471_v38 = vcombine.low %v602_v25, %v606_v48  ;;  %v4510_v25 = vcombine.high %v5025_v60, %v5027_v1 }
 0x247   :  { %3905 = vmatprep.subr.bf16.mxu1 %v4416_v39  ;;  %v4478_v39 = vcombine.high %v609_v33, %v613_v34  ;;  %v4480_v40 = vcombine.high %v610_v36, %v614_v37 }
 0x249   :  { %3734 = vmatpush1.bf16.msra.mxu0 %v4413_v44  ;;  %v622_v44 = vld [vmem:[#allocation8 + $0xd78] sm:$0xff] }
 0x24a   :  { %3906 = vmatpush1.bf16.msra.mxu1 %v4415_v45  ;;  %3735 = vmatprep.subr.bf16.mxu0 %v4422_v46  ;;  %v4477_v45 = vcombine.low %v609_v33, %v613_v34  ;;  %v4479_v46 = vcombine.low %v610_v36, %v614_v37  ;;  %v4488_v62 = vcombine.high %v618_v43, %v622_v44  ;;  %v3981_v34 = vld [vmem:[#allocation5 + $0x48] sm:$0xff] }
 0x24b   :  { %3907 = vmatprep.subr.bf16.mxu1 %v4424_v47  ;;  %v4486_v47 = vcombine.high %v617_v41, %v621_v42 }
 0x24d   :  { %3736 = vmatpush1.bf16.msra.mxu0 %v4421_v63  ;;  %v705_v63 = vld [vmem:[#allocation7 + $0x10] sm:$0xff] }
 0x24e   :  { %3908 = vmatpush1.bf16.msra.mxu1 %v4423_v3  ;;  %3737 = vmatprep.subr.bf16.mxu0 %v4430_v5  ;;  %v5011_v3 = vld [vmem:[#allocation8 + $0xd98] sm:$0xff] }
 0x24f   :  { %3909 = vmatprep.subr.bf16.mxu1 %v4432_v51  ;;  %v5013_v5 = vld [vmem:[#allocation8 + $0xdb8] sm:$0xff]  ;;  %v5015_v51 = vld [vmem:[#allocation8 + $0xdd0] sm:$0xff] }
 0x250   :  { %v4496_v10 = vcombine.high %v5011_v3, %v5013_v5  ;;  %v4501_v19 = vcombine.low %v5015_v51, %v5017_v54  ;;  %v4502_v20 = vcombine.high %v5015_v51, %v5017_v54  ;;  %v653_v54 = vld [vmem:[#allocation8 + $0xe70] sm:$0xff] }
 0x251   :  { %3738 = vmatpush1.bf16.msra.mxu0 %v4429_v56  ;;  %v5021_v56 = vld [vmem:[#allocation8 + $0xdf8] sm:$0xff] }
 0x252   :  { %3910 = vmatpush1.bf16.msra.mxu1 %v4431_v57  ;;  %3739 = vmatprep.subr.bf16.mxu0 %v4438_v58  ;;  %v704_v57 = vld [vmem:[#allocation7 + $0x8] sm:$0xff]  ;;  %v4487_v58 = vcombine.low %v618_v43, %v622_v44 }
 0x253   :  { %3911 = vmatprep.subr.bf16.mxu1 %v4440_v59  ;;  %v4494_v59 = vcombine.high %v5007_v2, %v5009_v50 }
 0x255   :  { %3740 = vmatpush1.bf16.msra.mxu0 %v4437_v7  ;;  %v706_v7 = vld [vmem:[#allocation7 + $0x18] sm:$0xff] }
 0x256   :  { %3912 = vmatpush1.bf16.msra.mxu1 %v4439_v8  ;;  %3752 = vmatprep.subr.bf16.mxu0 %v4446_v17  ;;  %v711_v8 = vld [vmem:[#allocation7 + $0x40] sm:$0xff]  ;;  %v4493_v17 = vcombine.low %v5007_v2, %v5009_v50 }
 0x257   :  { %3924 = vmatprep.subr.bf16.mxu1 %v4448_v9  ;;  %v4495_v9 = vcombine.low %v5011_v3, %v5013_v5 }
 0x258   :  { %3742 = vmatmul.mubr.bf16.vlgmr.msra.gmra.mrb[4].mxu0 %v4973_v0 }
 0x259   :  { %3914 = vmatmul.mubr.bf16.vlgmr.msra.gmra.mrb[4].mxu1 %v4973_v0  ;;  %3753 = vmatpush1.bf16.msra.mxu0 %v4445_v12  ;;  %v4463_v0 = vcombine.low %v594_v26, %v598_v22 }
 0x25a   :  { %3784 = vmatprep.mubr.bf16.mxu0 %v4978_v14  ;;  %3925 = vmatpush1.bf16.msra.mxu1 %v4447_v18  ;;  %v713_v18 = vld [vmem:[#allocation7 + $0x50] sm:$0xff] }
 0x25b   :  { %3956 = vmatprep.mubr.bf16.mxu1 %v4978_v14  ;;  %3754 = vmatprep.subr.bf16.mxu0 %v4454_v16  ;;  %v4469_v14 = vcombine.low %v601_v27, %v605_v49  ;;  %v712_v16 = vld [vmem:[#allocation7 + $0x48] sm:$0xff]  ;;  %v714_v27 = vld [vmem:[#allocation7 + $0x58] sm:$0xff]  ;;  %v4504_v49 = vcombine.high %v5019_v55, %v5021_v56 }
 0x25c   :  { %3926 = vmatprep.subr.bf16.mxu1 %v4456_v21  ;;  %v4503_v21 = vcombine.low %v5019_v55, %v5021_v56  ;;  %v650_v56 = vld [vmem:[#allocation8 + $0xe58] sm:$0xff] }
 0x25d   :  { %3755 = vmatpush1.bf16.msra.mxu0 %v4453_v30 }
 0x25e   :  { %3927 = vmatpush1.bf16.msra.mxu1 %v4455_v23  ;;  %3756 = vmatprep.subr.bf16.mxu0 %v4462_v24  ;;  %v3975_v23 = vld [vmem:[#allocation5 + $0x18] sm:$0xff] }
 0x25f   :  { %3928 = vmatprep.subr.bf16.mxu1 %v4464_v28  ;;  %v3980_v28 = vld [vmem:[#allocation5 + $0x40] sm:$0xff] }
 0x261   :  { %3757 = vmatpush1.bf16.msra.mxu0 %v4461_v31 }
 0x262   :  { %3929 = vmatpush1.bf16.msra.mxu1 %v4463_v0  ;;  %3758 = vmatprep.subr.bf16.mxu0 %v4470_v32 }
 0x263   :  { %3930 = vmatprep.subr.bf16.mxu1 %v4472_v35  ;;  %v3982_v35 = vld [vmem:[#allocation5 + $0x50] sm:$0xff] }
 0x265   :  { %3759 = vmatpush1.bf16.msra.mxu0 %v4469_v14 }
 0x266   :  { %3931 = vmatpush1.bf16.msra.mxu1 %v4471_v38  ;;  %3760 = vmatprep.subr.bf16.mxu0 %v4478_v39 }
 0x267   :  { %3932 = vmatprep.subr.bf16.mxu1 %v4480_v40  ;;  %v3983_v40 = vld [vmem:[#allocation5 + $0x58] sm:$0xff] }
 0x269   :  { %3761 = vmatpush1.bf16.msra.mxu0 %v4477_v45  ;;  %v642_v45 = vld [vmem:[#allocation8 + $0xe18] sm:$0xff] }
 0x26a   :  { %3933 = vmatpush1.bf16.msra.mxu1 %v4479_v46  ;;  %3762 = vmatprep.subr.bf16.mxu0 %v4486_v47  ;;  %v646_v46 = vld [vmem:[#allocation8 + $0xe38] sm:$0xff] }
 0x26b   :  { %v3442_v4 = vpop.f32.mrb[0].mxu0  ;;  %3934 = vmatprep.subr.bf16.mxu1 %v4488_v62 }
 0x26c   :  { %v4569_v11 = vadd.f32 %v3442_v4, %v703_v61  ;;  %v3614_v12 = vpop.f32.mrb[0].mxu1  ;;  %v3444_v13 = vpop.f32.mrb[1].mxu0 }
 0x26d   :  { %v4573_v26 = vadd.f32 %v3614_v12, %v705_v63  ;;  %v4570_v22 = vadd.f32 %v3444_v13, %v704_v57  ;;  %v3616_v30 = vpop.f32.mrb[1].mxu1  ;;  %v3446_v24 = vpop.f32.mrb[2].mxu0  ;;  %3763 = vmatpush1.bf16.msra.mxu0 %v4485_v53  ;;  %v649_v53 = vld [vmem:[#allocation8 + $0xe50] sm:$0xff]  ;;  %v654_v57 = vld [vmem:[#allocation8 + $0xe78] sm:$0xff] }
 0x26e   :  { %v3988_v48 = vsub.f32 %v4569_v11, %v3972_v52  ;;  %v4574_v31 = vadd.f32 %v3616_v30, %v706_v7  ;;  %v4571_v0 = vadd.f32 %v3446_v24, %v711_v8  ;;  %v3618_v32 = vpop.f32.mrb[2].mxu1  ;;  %3935 = vmatpush1.bf16.msra.mxu1 %v4487_v58  ;;  %v3448_v33 = vpop.f32.mrb[3].mxu0  ;;  %3764 = vmatprep.subr.bf16.mxu0 %v4494_v59  ;;  %v657_v7 = vld [vmem:[#allocation8 + $0xe90] sm:$0xff]  ;;  %v674_v30 = vld [vmem:[#allocation8 + $0xf18] sm:$0xff] }
 0x26f   :  { %v3990_v36 = vsub.f32 %v4573_v26, %v3974_v6  ;;  %v3989_v37 = vsub.f32 %v4570_v22, %v3973_v15  ;;  %v4575_v14 = vadd.f32 %v3618_v32, %v713_v18  ;;  %v4572_v38 = vadd.f32 %v3448_v33, %v712_v16  ;;  %v3620_v39 = vpop.f32.mrb[3].mxu1  ;;  %3936 = vmatprep.subr.bf16.mxu1 %v4496_v10  ;;  %v661_v8 = vld [vmem:[#allocation8 + $0xeb0] sm:$0xff]  ;;  %v666_v15 = vld [vmem:[#allocation8 + $0xed8] sm:$0xff] }
 0x270   :  { %v4004_v41 = vmul.f32 %v3988_v48, %v3988_v48  ;;  %v3991_v42 = vsub.f32 %v4574_v31, %v3975_v23  ;;  %v3996_v43 = vsub.f32 %v4571_v0, %v3980_v28  ;;  %v4576_v44 = vadd.f32 %v3620_v39, %v714_v27  ;;  %v670_v18 = vld [vmem:[#allocation8 + $0xef8] sm:$0xff]  ;;  %v673_v26 = vld [vmem:[#allocation8 + $0xf10] sm:$0xff] }
 0x271   :  { %v4006_v47 = vmul.f32 %v3990_v36, %v3990_v36  ;;  %v4005_v61 = vmul.f32 %v3989_v37, %v3989_v37  ;;  %v3998_v62 = vsub.f32 %v4575_v14, %v3982_v35  ;;  %v3997_v2 = vsub.f32 %v4572_v38, %v3981_v34  ;;  %3765 = vmatpush1.bf16.msra.mxu0 %v4493_v17  ;;  %v658_v17 = vld [vmem:[#allocation8 + $0xe98] sm:$0xff]  ;;  %v677_v22 = vld [vmem:[#allocation8 + $0xf30] sm:$0xff] }
 0x272   :  { %4020 = vst [vmem:[#allocation10] sm:$0xff] %v4004_v41  ;;  %v4007_v50 = vmul.f32 %v3991_v42, %v3991_v42  ;;  %v4012_v63 = vmul.f32 %v3996_v43, %v3996_v43  ;;  %v3999_v3 = vsub.f32 %v4576_v44, %v3983_v40  ;;  %3937 = vmatpush1.bf16.msra.mxu1 %v4495_v9  ;;  %v662_v9 = vld [vmem:[#allocation8 + $0xeb8] sm:$0xff]  ;;  %v685_v48 = vld [vmem:[#allocation8 + $0xf70] sm:$0xff] }
 0x273   :  { %3766 = vmatprep.subr.bf16.mxu0 %v4502_v20  ;;  %4022 = vst [vmem:[#allocation10 + $0x10] sm:$0xff] %v4006_v47  ;;  %4021 = vst [vmem:[#allocation10 + $0x8] sm:$0xff] %v4005_v61  ;;  %v4014_v5 = vmul.f32 %v3998_v62, %v3998_v62  ;;  %v4013_v51 = vmul.f32 %v3997_v2, %v3997_v2  ;;  %3938 = vmatprep.subr.bf16.mxu1 %v4504_v49  ;;  %v678_v23 = vld [vmem:[#allocation8 + $0xf38] sm:$0xff]  ;;  %v689_v36 = vld [vmem:[#allocation8 + $0xf90] sm:$0xff] }
 0x274   :  { %v4512_v52 = vcombine.high %v642_v45, %v646_v46  ;;  %4023 = vst [vmem:[#allocation10 + $0x18] sm:$0xff] %v4007_v50  ;;  %4028 = vst [vmem:[#allocation10 + $0x40] sm:$0xff] %v4012_v63  ;;  %v4015_v55 = vmul.f32 %v3999_v3, %v3999_v3  ;;  %v4509_v58 = vcombine.low %v5025_v60, %v5027_v1  ;;  %v665_v60 = vld [vmem:[#allocation8 + $0xed0] sm:$0xff]  ;;  %v682_v31 = vld [vmem:[#allocation8 + $0xf58] sm:$0xff] }
 0x275   :  { %4030 = vst [vmem:[#allocation10 + $0x50] sm:$0xff] %v4014_v5  ;;  %4029 = vst [vmem:[#allocation10 + $0x48] sm:$0xff] %v4013_v51  ;;  %3767 = vmatpush1.bf16.msra.mxu0 %v4501_v19  ;;  %v4511_v59 = vcombine.low %v642_v45, %v646_v46  ;;  %v4518_v4 = vcombine.high %v649_v53, %v653_v54  ;;  %v4520_v6 = vcombine.high %v650_v56, %v654_v57  ;;  %v669_v1 = vld [vmem:[#allocation8 + $0xef0] sm:$0xff]  ;;  %v686_v0 = vld [vmem:[#allocation8 + $0xf78] sm:$0xff] }
 0x276   :  { %4031 = vst [vmem:[#allocation10 + $0x58] sm:$0xff] %v4015_v55  ;;  %3939 = vmatpush1.bf16.msra.mxu1 %v4503_v21  ;;  %3768 = vmatprep.subr.bf16.mxu0 %v4510_v25  ;;  %v4517_v10 = vcombine.low %v649_v53, %v653_v54  ;;  %v4519_v11 = vcombine.low %v650_v56, %v654_v57  ;;  %v681_v25 = vld [vmem:[#allocation8 + $0xf50] sm:$0xff]  ;;  %v690_v14 = vld [vmem:[#allocation8 + $0xf98] sm:$0xff]  ;;  %v707_v3 = vld [vmem:[#allocation7 + $0x20] sm:$0xff] }
 0x277   :  { %3940 = vmatprep.subr.bf16.mxu1 %v4512_v52  ;;  %v4526_v12 = vcombine.high %v657_v7, %v661_v8  ;;  %v4528_v13 = vcombine.high %v658_v17, %v662_v9  ;;  %v4525_v16 = vcombine.low %v657_v7, %v661_v8  ;;  %v4527_v19 = vcombine.low %v658_v17, %v662_v9  ;;  %v693_v37 = vld [vmem:[#allocation8 + $0xfb0] sm:$0xff]  ;;  %v694_v38 = vld [vmem:[#allocation8 + $0xfb8] sm:$0xff]  ;;  %v3976_v5 = vld [vmem:[#allocation5 + $0x20] sm:$0xff] }
 0x278   :  { %v4534_v20 = vcombine.high %v665_v60, %v669_v1  ;;  %v4536_v21 = vcombine.high %v666_v15, %v670_v18  ;;  %v4533_v24 = vcombine.low %v665_v60, %v669_v1  ;;  %v4535_v28 = vcombine.low %v666_v15, %v670_v18  ;;  %v697_v43 = vld [vmem:[#allocation8 + $0xfd0] sm:$0xff]  ;;  %v698_v45 = vld [vmem:[#allocation8 + $0xfd8] sm:$0xff]  ;;  %v708_v52 = vld [vmem:[#allocation7 + $0x28] sm:$0xff] }
 0x279   :  { %3769 = vmatpush1.bf16.msra.mxu0 %v4509_v58  ;;  %v4542_v27 = vcombine.high %v673_v26, %v677_v22  ;;  %v4544_v49 = vcombine.high %v674_v30, %v678_v23  ;;  %v4541_v32 = vcombine.low %v673_v26, %v677_v22  ;;  %v4543_v35 = vcombine.low %v674_v30, %v678_v23  ;;  %v701_v44 = vld [vmem:[#allocation8 + $0xff0] sm:$0xff]  ;;  %v702_v46 = vld [vmem:[#allocation8 + $0xff8] sm:$0xff]  ;;  %v715_v56 = vld [vmem:[#allocation7 + $0x60] sm:$0xff] }
 0x27a   :  { %3941 = vmatpush1.bf16.msra.mxu1 %v4511_v59  ;;  %3770 = vmatprep.subr.bf16.mxu0 %v4518_v4  ;;  %v4550_v33 = vcombine.high %v681_v25, %v685_v48  ;;  %v4552_v34 = vcombine.high %v682_v31, %v686_v0  ;;  %v4549_v39 = vcombine.low %v681_v25, %v685_v48  ;;  %v709_v51 = vld [vmem:[#allocation7 + $0x30] sm:$0xff]  ;;  %v710_v55 = vld [vmem:[#allocation7 + $0x38] sm:$0xff]  ;;  %v3977_v4 = vld [vmem:[#allocation5 + $0x28] sm:$0xff] }
 0x27b   :  { %3942 = vmatprep.subr.bf16.mxu1 %v4520_v6  ;;  %v4551_v40 = vcombine.low %v682_v31, %v686_v0  ;;  %v4558_v41 = vcombine.high %v689_v36, %v693_v37  ;;  %v4560_v42 = vcombine.high %v690_v14, %v694_v38  ;;  %v4557_v47 = vcombine.low %v689_v36, %v693_v37  ;;  %v3978_v54 = vld [vmem:[#allocation5 + $0x30] sm:$0xff]  ;;  %v716_v7 = vld [vmem:[#allocation7 + $0x68] sm:$0xff]  ;;  %v3987_v23 = vld [vmem:[#allocation5 + $0x78] sm:$0xff] }
 0x27c   :  { %v4559_v61 = vcombine.low %v690_v14, %v694_v38  ;;  %v4566_v62 = vcombine.high %v697_v43, %v701_v44  ;;  %v4568_v2 = vcombine.high %v698_v45, %v702_v46  ;;  %v4565_v50 = vcombine.low %v697_v43, %v701_v44  ;;  %v717_v6 = vld [vmem:[#allocation7 + $0x70] sm:$0xff] }
 0x27d   :  { %3771 = vmatpush1.bf16.msra.mxu0 %v4517_v10  ;;  %v4567_v63 = vcombine.low %v698_v45, %v702_v46  ;;  %v3979_v10 = vld [vmem:[#allocation5 + $0x38] sm:$0xff]  ;;  %v3986_v18 = vld [vmem:[#allocation5 + $0x70] sm:$0xff] }
 0x27e   :  { %3943 = vmatpush1.bf16.msra.mxu1 %v4519_v11  ;;  %3772 = vmatprep.subr.bf16.mxu0 %v4526_v12  ;;  %v718_v12 = vld [vmem:[#allocation7 + $0x78] sm:$0xff] }
 0x27f   :  { %3944 = vmatprep.subr.bf16.mxu1 %v4528_v13 }
 0x281   :  { %3773 = vmatpush1.bf16.msra.mxu0 %v4525_v16 }
 0x282   :  { %3945 = vmatpush1.bf16.msra.mxu1 %v4527_v19  ;;  %3774 = vmatprep.subr.bf16.mxu0 %v4534_v20  ;;  %v3985_v19 = vld [vmem:[#allocation5 + $0x68] sm:$0xff] }
 0x283   :  { %3946 = vmatprep.subr.bf16.mxu1 %v4536_v21 }
 0x285   :  { %3775 = vmatpush1.bf16.msra.mxu0 %v4533_v24 }
 0x286   :  { %3947 = vmatpush1.bf16.msra.mxu1 %v4535_v28  ;;  %3776 = vmatprep.subr.bf16.mxu0 %v4542_v27 }
 0x287   :  { %3948 = vmatprep.subr.bf16.mxu1 %v4544_v49 }
 0x289   :  { %3777 = vmatpush1.bf16.msra.mxu0 %v4541_v32 }
 0x28a   :  { %3949 = vmatpush1.bf16.msra.mxu1 %v4543_v35  ;;  %3778 = vmatprep.subr.bf16.mxu0 %v4550_v33 }
 0x28b   :  { %3950 = vmatprep.subr.bf16.mxu1 %v4552_v34 }
 0x28d   :  { %3779 = vmatpush1.bf16.msra.mxu0 %v4549_v39 }
 0x28e   :  { %3951 = vmatpush1.bf16.msra.mxu1 %v4551_v40  ;;  %3780 = vmatprep.subr.bf16.mxu0 %v4558_v41 }
 0x28f   :  { %3952 = vmatprep.subr.bf16.mxu1 %v4560_v42 }
 0x291   :  { %3781 = vmatpush1.bf16.msra.mxu0 %v4557_v47 }
 0x292   :  { %3953 = vmatpush1.bf16.msra.mxu1 %v4559_v61  ;;  %3782 = vmatprep.subr.bf16.mxu0 %v4566_v62 }
 0x293   :  { %3954 = vmatprep.subr.bf16.mxu1 %v4568_v2 }
 0x295   :  { %3783 = vmatpush1.bf16.msra.mxu0 %v4565_v50 }
 0x296   :  { %3955 = vmatpush1.bf16.msra.mxu1 %v4567_v63 }
 0x298   :  { %3785 = vmatmul.mubr.bf16.vlgmr.msra.gmra.mrb[4].mxu0 %v4981_v29 }
 0x299   :  { %3957 = vmatmul.mubr.bf16.vlgmr.msra.gmra.mrb[4].mxu1 %v4981_v29  ;;  %v3984_v29 = vld [vmem:[#allocation5 + $0x60] sm:$0xff] }
 0x36b   :  { %v3786_v53 = vpop.f32.mrb[4].mxu0 }
 0x36c   :  { %v4577_v57 = vadd.f32 %v3786_v53, %v707_v3  ;;  %v3958_v58 = vpop.f32.mrb[4].mxu1  ;;  %v3788_v59 = vpop.f32.mrb[5].mxu0 }
 0x36d   :  { %v4581_v8 = vadd.f32 %v3958_v58, %v709_v51  ;;  %v4578_v17 = vadd.f32 %v3788_v59, %v708_v52  ;;  %v3960_v9 = vpop.f32.mrb[5].mxu1  ;;  %v3790_v11 = vpop.f32.mrb[6].mxu0 }
 0x36e   :  { %v3992_v13 = vsub.f32 %v4577_v57, %v3976_v5  ;;  %v4582_v60 = vadd.f32 %v3960_v9, %v710_v55  ;;  %v4579_v1 = vadd.f32 %v3790_v11, %v715_v56  ;;  %v3962_v15 = vpop.f32.mrb[6].mxu1  ;;  %v3792_v16 = vpop.f32.mrb[7].mxu0 }
 0x36f   :  { %v3994_v20 = vsub.f32 %v4581_v8, %v3978_v54  ;;  %v3993_v21 = vsub.f32 %v4578_v17, %v3977_v4  ;;  %v4583_v26 = vadd.f32 %v3962_v15, %v717_v6  ;;  %v4580_v22 = vadd.f32 %v3792_v16, %v716_v7  ;;  %v3964_v30 = vpop.f32.mrb[7].mxu1 }
 0x370   :  { %v4008_v24 = vmul.f32 %v3992_v13, %v3992_v13  ;;  %v3995_v28 = vsub.f32 %v4582_v60, %v3979_v10  ;;  %v4000_v27 = vsub.f32 %v4579_v1, %v3984_v29  ;;  %v4584_v49 = vadd.f32 %v3964_v30, %v718_v12 }
 0x371   :  { %v4010_v25 = vmul.f32 %v3994_v20, %v3994_v20  ;;  %v4009_v48 = vmul.f32 %v3993_v21, %v3993_v21  ;;  %v4002_v31 = vsub.f32 %v4583_v26, %v3986_v18  ;;  %v4001_v0 = vsub.f32 %v4580_v22, %v3985_v19 }
 0x372   :  { %4024 = vst [vmem:[#allocation10 + $0x20] sm:$0xff] %v4008_v24  ;;  %v4011_v32 = vmul.f32 %v3995_v28, %v3995_v28  ;;  %v4016_v35 = vmul.f32 %v4000_v27, %v4000_v27  ;;  %v4003_v33 = vsub.f32 %v4584_v49, %v3987_v23 }
 0x373   :  { %4026 = vst [vmem:[#allocation10 + $0x30] sm:$0xff] %v4010_v25  ;;  %4025 = vst [vmem:[#allocation10 + $0x28] sm:$0xff] %v4009_v48  ;;  %v4018_v34 = vmul.f32 %v4002_v31, %v4002_v31  ;;  %v4017_v36 = vmul.f32 %v4001_v0, %v4001_v0 }
 0x374   :  { %4027 = vst [vmem:[#allocation10 + $0x38] sm:$0xff] %v4011_v32  ;;  %4032 = vst [vmem:[#allocation10 + $0x60] sm:$0xff] %v4016_v35  ;;  %v4019_v37 = vmul.f32 %v4003_v33, %v4003_v33 }
 0x375   :  { %4034 = vst [vmem:[#allocation10 + $0x70] sm:$0xff] %v4018_v34  ;;  %4033 = vst [vmem:[#allocation10 + $0x68] sm:$0xff] %v4017_v36 }
 0x376   :  { %4035 = vst [vmem:[#allocation10 + $0x78] sm:$0xff] %v4019_v37 }
 0x377   :  { %4744 = shalt.err (!%p4741_p8)
}
 0x378   :  { %s4745_s0 = scalar_lea.hbm %s5070_s6, 2048 }
 0x379   :  { %p4746_p9 = scmp.ne.s32.totalorder %s5070_s6, %s4745_s0  ;;  %p4749_p10 = scmp.lt.u32.totalorder %s4745_s0, %s5070_s6 }
 0x37b   :  { %p4751_p11 = pnand %p4749_p10, %p4746_p9 }
 0x37d   :  { %4754 = shalt.err (!%p4751_p11)
}
 0x37e   :  { %4047 = dma.vmem_to_hbm [thread:$0]  %s4042_s3, 2048, %s5070_s6, [#allocation4], %s4765_s9, %s4765_s9, %s4766_s10  }
 0x37f   :  { %4761 = dma.done.wait [#allocation4], 2048  }
 0x380   :  { %4762 = vsyncadd [#allocation4], 4294965248 }
 0x381   :  { %4051 = vsyncpa [#allocation3], 1 }
 0x382   :  { %4052 = vsyncpa [#allocation6], 1 }
 0x383   :  { %4053 = vsyncpa [#allocation9], 1 }
 0x384   :  { %4054 = vsyncpa [#allocation4], 1 }

</bundles_post_ra>
